<compile_context>
chip_gen: v5e
topology: v5e:2x2
jax: 0.10.0
libtpu: 0.0.40
codegen_flags: <defaults>
</compile_context>

<pallas_src>
import math
import numpy as np
import jax
import jax.numpy as jnp
from jax.experimental import pallas as pl
from jax.experimental.pallas import tpu as pltpu

EPSILON = 1e-9          # only used by the float64 NumPy reference
LANES = 128
SUBLANES = 8
NUM_FWD_RAYS = 14       # 2 field groups x 7 rays
U_REV = 0.1 / 180.0 * math.pi


# ---------------------------------------------------------------------------
# Fused kernel: reverse trace -> entrance pupil -> build forward rays ->
# forward trace.  All surface parameters are compile-time constants.
# ---------------------------------------------------------------------------
def make_optical_kernel(rev_params, fwd_params, stop_position, sin_urev, cos_urev):
    def kernel(qbase_ref, qcoef_ref, su0_ref, cu0_ref,
               epd_ref, tq_ref, tsu_ref, tcu_ref):
        shape = (SUBLANES, LANES)
        lane = jax.lax.broadcasted_iota(jnp.int32, shape, 1)

        # ---- reverse trace: lane 0 = +u ray, lane 1 = -u ray, padding = +u --
        su = jnp.where(lane == 1, -sin_urev, sin_urev).astype(jnp.float32)
        cu = jnp.full(shape, cos_urev, jnp.float32)
        q = jnp.zeros(shape, jnp.float32)
        p = stop_position                              # python float
        for sp in rev_params:                          # static unroll
            q1 = q - su * (p - sp["z"])
            if sp["is_flat"]:
                # analytic c->0 limit of the module's (c+EPSILON) path
                su_n = su * sp["n_ratio"]              # n_ratio = n1/n
                cu_n = jnp.sqrt(jnp.maximum(1.0 - su_n * su_n, 0.0))
                q = q1 * cu_n / cu
            else:
                sinI1 = sp["c"] * q1 + su
                cosI1 = jnp.sqrt(jnp.maximum(1.0 - sinI1 * sinI1, 0.0))
                sinI = sinI1 * sp["n_ratio"]
                cosI = jnp.sqrt(jnp.maximum(1.0 - sinI * sinI, 0.0))
                # delta = asin(sinI) - asin(sinI1); u_new = u + delta
                sinD = sinI * cosI1 - cosI * sinI1
                cosD = cosI * cosI1 + sinI * sinI1
                su_n = su * cosD + cu * sinD
                cu_n = cu * cosD - su * sinD
                q = (sinI - su_n) * sp["inv_c"]
            su, cu = su_n, cu_n
            p = sp["z"]

        # ---- entrance pupil z: one signed-mask reduce per quantity ----------
        tanu = su / cu
        term = tanu * (p - q / su)
        sgn = jnp.where(lane == 0, 1.0, jnp.where(lane == 1, -1.0, 0.0))
        num = jnp.sum(sgn * term, axis=-1, keepdims=True)   # term[0]-term[1]
        den = jnp.sum(sgn * tanu, axis=-1, keepdims=True)   # tanu[0]-tanu[1]
        epd_b = jnp.broadcast_to(num / den, shape)
        epd_ref[...] = epd_b

        # ---- build the 14 forward rays (edge-field q depends on epd) --------
        q = qbase_ref[...] + qcoef_ref[...] * epd_b
        su = su0_ref[...]
        cu = cu0_ref[...]
        tq_ref[0] = q
        tsu_ref[0] = su
        tcu_ref[0] = cu

        # ---- forward trace over all surfaces (static unroll) ----------------
        for s, sp in enumerate(fwd_params):
            q = q + su * sp["t"]
            if sp["is_flat"]:
                su_n = su * sp["n_ratio"]              # n_ratio = n/n1
                cu_n = jnp.sqrt(jnp.maximum(1.0 - su_n * su_n, 0.0))
                q = q * cu_n / cu
            else:
                sinI = q * sp["c"] + su
                cosI = jnp.sqrt(jnp.maximum(1.0 - sinI * sinI, 0.0))
                sinI1 = sinI * sp["n_ratio"]
                cosI1 = jnp.sqrt(jnp.maximum(1.0 - sinI1 * sinI1, 0.0))
                # delta = asin(sinI1) - asin(sinI); u_new = u + delta
                sinD = sinI1 * cosI - cosI1 * sinI
                cosD = cosI1 * cosI + sinI1 * sinI
                su_n = su * cosD + cu * sinD
                cu_n = cu * cosD - su * sinD
                q = (sinI1 - su_n) * sp["inv_c"]
            su, cu = su_n, cu_n
            tq_ref[s + 1] = q
            tsu_ref[s + 1] = su
            tcu_ref[s + 1] = cu

    return kernel


# ---------------------------------------------------------------------------
# Wrapper reproducing OpticalSystemModule.forward()
# ---------------------------------------------------------------------------
def optical_system_forward(c_arr, d_arr, n_arr, EPD, field_deg,
                           stop_face=None, stop_position=None):
    c_arr = np.asarray(c_arr, np.float64)
    d_arr = np.asarray(d_arr, np.float64)   # thickness after each surface (=1/t)
    n_arr = np.asarray(n_arr, np.float64)   # refractive index after each surface
    S = c_arr.shape[0]
    field = float(field_deg) / 180.0 * math.pi

    # flash_surface_z_potion
    z = np.zeros(S, np.float64)
    for i in range(S - 1):
        z[i + 1] = z[i] + d_arr[i]

    # get_cur_entrance_puplil_position
    if stop_position is None and stop_face is None:
        stop_position = 0.0
    if stop_face is not None:
        stop_position = float(z[stop_face])

    # surfaces in front of the stop (reverse trace)
    front_material = 1
    for i in range(S):
        if z[i] >= stop_position:
            break
        front_material += 1
    R = front_material - 1

    rev_params = []
    for idx in range(R):                      # processing order: surface R-1 .. 0
        si = R - 1 - idx
        c = float(c_arr[si])
        flat = (c == 0.0)
        n1 = float(n_arr[si])
        n = float(n_arr[si - 1]) if si > 0 else 1.0
        rev_params.append(dict(is_flat=flat, c=c,
                               inv_c=0.0 if flat else 1.0 / c,
                               n_ratio=n1 / n, z=float(z[si])))

    fwd_params = []
    for i in range(S):
        c = float(c_arr[i])
        flat = (c == 0.0)
        n1 = float(n_arr[i])
        if i > 0:
            n, t = float(n_arr[i - 1]), float(d_arr[i - 1])
        else:
            n, t = 1.0, 0.0
        fwd_params.append(dict(is_flat=flat, c=c,
                               inv_c=0.0 if flat else 1.0 / c,
                               n_ratio=n / n1, t=t))

    # static initial-ray tiles: lanes 0..6 center field, 7..13 edge field.
    # q0 = qbase + qcoef * epd (epd is computed inside the kernel).
    sin_f, cos_f = math.sin(field), math.cos(field)
    step = float(EPD) / 6.0
    ks = np.array([0., 1., -1., 2., -2., 3., -3.], np.float64)
    qbase = np.zeros(LANES); qcoef = np.zeros(LANES)
    su0 = np.zeros(LANES);   cu0 = np.ones(LANES)
    qbase[0:7] = ks * step
    qbase[7:14] = ks * step * cos_f
    qcoef[7:14] = -sin_f
    su0[7:14] = sin_f
    cu0[7:14] = cos_f

    def tile(row):
        return jnp.asarray(np.tile(row.astype(np.float32)[None, :], (SUBLANES, 1)))

    n_steps = S + 1
    kernel = make_optical_kernel(rev_params, fwd_params, float(stop_position),
                                 math.sin(U_REV), math.cos(U_REV))

    ray_spec = pl.BlockSpec((SUBLANES, LANES), lambda i: (0, 0))
    trace_spec = pl.BlockSpec((n_steps, SUBLANES, LANES), lambda i: (0, 0, 0))
    trace_shape = jax.ShapeDtypeStruct((n_steps, SUBLANES, LANES), jnp.float32)

    epd_tile, tq, tsu, tcu = pl.pallas_call(
        kernel,
        out_shape=(jax.ShapeDtypeStruct((SUBLANES, LANES), jnp.float32),
                   trace_shape, trace_shape, trace_shape),
        grid=(1,),
        in_specs=[ray_spec, ray_spec, ray_spec, ray_spec],
        out_specs=(ray_spec, trace_spec, trace_spec, trace_spec),
        compiler_params=pltpu.CompilerParams(dimension_semantics=("arbitrary",)),
    )(tile(qbase), tile(qcoef), tile(su0), tile(cu0))

    epd_position = epd_tile[0, 0]
    q_trace = tq[:, 0, :NUM_FWD_RAYS]
    # u recovered from (sin u, cos u); exact for |u| < pi (physical ray angles)
    u_trace = jnp.arctan2(tsu[:, 0, :NUM_FWD_RAYS], tcu[:, 0, :NUM_FWD_RAYS])
    p_trace = jnp.asarray(np.concatenate([[0.0], z]).astype(np.float32))

    # trace layout: (S+1 states incl. input) x (2 field groups) x (7 rays)
    return (epd_position,
            q_trace.reshape(n_steps, 2, 7),
            u_trace.reshape(n_steps, 2, 7),
            p_trace)


# ---------------------------------------------------------------------------
# Pure NumPy (float64) transcription of the PyTorch module, for verification.
# (Matches the module exactly: flat surfaces take the c+EPSILON curved path.)
# ---------------------------------------------------------------------------
def reference_forward(c_arr, d_arr, n_arr, EPD, field_deg,
                      stop_face=None, stop_position=None):
    c_arr = np.asarray(c_arr, np.float64)
    d_arr = np.asarray(d_arr, np.float64)
    n_arr = np.asarray(n_arr, np.float64)
    S = len(c_arr)
    field = field_deg / 180.0 * np.pi
    z = np.zeros(S)
    for i in range(S - 1):
        z[i + 1] = z[i] + d_arr[i]
    if stop_position is None and stop_face is None:
        stop_position = 0.0
    if stop_face is not None:
        stop_position = z[stop_face]

    u_r = 0.1 / 180.0 * np.pi
    cur = [(0.0, u_r, stop_position), (0.0, -u_r, stop_position)]
    front_material = 1
    for i in range(S):
        if z[i] >= stop_position:
            break
        front_material += 1
    R = front_material - 1
    for idx in range(R):
        si = R - 1 - idx
        c = c_arr[si]
        if c == 0.0:
            c = c + EPSILON
        n1, zz = n_arr[si], z[si]
        n = n_arr[si - 1] if si > 0 else 1.0
        new = []
        for (q2, u1, p1) in cur:
            q1 = q2 - np.sin(u1) * (p1 - zz)
            sinI1 = c * q1 + np.sin(u1)
            I1 = np.arcsin(sinI1)
            sinI = n1 * sinI1 / n
            I = np.arcsin(sinI)
            u = u1 + I - I1
            q = (sinI - np.sin(u)) / c
            new.append((q, u, zz))
        cur = new
    (q1_, u1_, p1_), (q2_, u2_, p2_) = cur[0], cur[1]
    epd_pos = ((np.tan(u1_) * (p1_ - q1_ / np.sin(u1_))
                - np.tan(u2_) * (p2_ - q2_ / np.sin(u2_)))
               / (np.tan(u1_) - np.tan(u2_)))

    step = EPD / 6.0
    ks = np.array([0, 1, -1, 2, -2, 3, -3], np.float64)
    q = np.concatenate([ks * step,
                        -epd_pos * np.sin(field) + ks * step * np.cos(field)])
    u = np.concatenate([np.zeros(7), np.full(7, field)])
    trace_q, trace_u = [q.copy()], [u.copy()]
    for i in range(S):
        c = c_arr[i]
        if c == 0.0:
            c = c + EPSILON
        n1 = n_arr[i]
        if i > 0:
            n, t = n_arr[i - 1], d_arr[i - 1]
        else:
            n, t = 1.0, 0.0
        qq = q + np.sin(u) * t
        sinI = qq * c + np.sin(u)
        sinI1 = n * sinI / n1
        u1 = u - np.arcsin(sinI) + np.arcsin(sinI1)
        q1 = (sinI1 - np.sin(u1)) / c
        q, u = q1, u1
        trace_q.append(q.copy())
        trace_u.append(u.copy())
    return epd_pos, np.stack(trace_q), np.stack(trace_u)


if __name__ == "__main__":
    # Deterministic small optical system (5 surfaces, incl. one flat surface)
    # perturbed by PRNGKey(0).
    key = jax.random.PRNGKey(0)
    kc, kd = jax.random.split(key)
    base_c = np.array([0.02, -0.015, 0.0, -0.01, 0.005])   # curvatures (1/r), one flat
    base_d = np.array([5.0, 2.0, 3.0, 40.0, 1.0])          # thicknesses (=1/t)
    n_glass = np.array([1.5168, 1.0, 1.6727, 1.0, 1.0])    # indices after each surface
    c_arr = base_c * (1.0 + 0.05 * np.asarray(
        jax.random.uniform(kc, (5,), minval=-1.0, maxval=1.0), np.float64))
    d_arr = base_d * (1.0 + 0.05 * np.asarray(
        jax.random.uniform(kd, (5,), minval=-1.0, maxval=1.0), np.float64))
    EPD, field_deg, stop_face = 10.0, 5.0, 3

    epd_pos, q_tr, u_tr, p_tr = optical_system_forward(
        c_arr, d_arr, n_glass, EPD, field_deg, stop_face=stop_face)
    jax.block_until_ready((epd_pos, q_tr, u_tr, p_tr))

    epd_ref, q_ref, u_ref = reference_forward(
        c_arr, d_arr, n_glass, EPD, field_deg, stop_face=stop_face)

    S1 = len(c_arr) + 1
    assert np.allclose(float(epd_pos), epd_ref, rtol=1e-3, atol=1e-3), \
        (float(epd_pos), epd_ref)
    assert np.allclose(np.asarray(q_tr).reshape(S1, 14), q_ref, rtol=1e-3, atol=1e-3)
    assert np.allclose(np.asarray(u_tr).reshape(S1, 14), u_ref, rtol=1e-3, atol=1e-3)
    print("KERNEL_OK")
</pallas_src>

<mosaic_0001>
module attributes {stable_mosaic.version = 11 : i64} {
  func.func @kernel(%arg0: i32, %arg1: memref<8x128xf32, #tpu.memory_space<vmem>>, %arg2: memref<8x128xf32, #tpu.memory_space<vmem>>, %arg3: memref<8x128xf32, #tpu.memory_space<vmem>>, %arg4: memref<8x128xf32, #tpu.memory_space<vmem>>, %arg5: memref<8x128xf32, #tpu.memory_space<vmem>>, %arg6: memref<6x8x128xf32, #tpu.memory_space<vmem>>, %arg7: memref<6x8x128xf32, #tpu.memory_space<vmem>>, %arg8: memref<6x8x128xf32, #tpu.memory_space<vmem>>) attributes {dimension_semantics = [#tpu.dimension_semantics<arbitrary>], iteration_bounds = array<i64: 1>, scalar_prefetch = 0 : i64, scratch_operands = 0 : i64, tpu.core_type = #tpu.core_type<tc>, window_params = [{pipeline_mode = #tpu.pipeline_mode<synchronous>, transform_indices = @transform_0, window_bounds = array<i64: 8, 128>}, {pipeline_mode = #tpu.pipeline_mode<synchronous>, transform_indices = @transform_1, window_bounds = array<i64: 8, 128>}, {pipeline_mode = #tpu.pipeline_mode<synchronous>, transform_indices = @transform_2, window_bounds = array<i64: 8, 128>}, {pipeline_mode = #tpu.pipeline_mode<synchronous>, transform_indices = @transform_3, window_bounds = array<i64: 8, 128>}, {pipeline_mode = #tpu.pipeline_mode<synchronous>, transform_indices = @transform_4, window_bounds = array<i64: 8, 128>}, {pipeline_mode = #tpu.pipeline_mode<synchronous>, transform_indices = @transform_5, window_bounds = array<i64: 6, 8, 128>}, {pipeline_mode = #tpu.pipeline_mode<synchronous>, transform_indices = @transform_6, window_bounds = array<i64: 6, 8, 128>}, {pipeline_mode = #tpu.pipeline_mode<synchronous>, transform_indices = @transform_7, window_bounds = array<i64: 6, 8, 128>}]} {
    %0 = tpu.iota {dimensions = array<i32: 1>} : vector<8x128xi32>
    %c1_i32 = arith.constant 1 : i32
    %1 = vector.broadcast %c1_i32 : i32 to vector<8x128xi32>
    %2 = arith.cmpi eq, %0, %1 : vector<8x128xi32>
    %cst = arith.constant -0.00174532842 : f32
    %cst_0 = arith.constant 0.00174532842 : f32
    %3 = vector.broadcast %cst : f32 to vector<8x128xf32>
    %4 = vector.broadcast %cst_0 : f32 to vector<8x128xf32>
    %5 = arith.select %2, %3, %4 : vector<8x128xi1>, vector<8x128xf32>
    %cst_1 = arith.constant 0.99999845 : f32
    %6 = vector.broadcast %cst_1 : f32 to vector<8x128xf32>
    %cst_2 = arith.constant 0.000000e+00 : f32
    %7 = vector.broadcast %cst_2 : f32 to vector<8x128xf32>
    %cst_3 = arith.constant 3.02442789 : f32
    %8 = vector.broadcast %cst_3 : f32 to vector<8x128xf32>
    %9 = arith.mulf %5, %8 : vector<8x128xf32>
    %10 = arith.subf %7, %9 : vector<8x128xf32>
    %cst_4 = arith.constant 1.672700e+00 : f32
    %11 = vector.broadcast %cst_4 : f32 to vector<8x128xf32>
    %12 = arith.mulf %5, %11 : vector<8x128xf32>
    %13 = arith.mulf %12, %12 : vector<8x128xf32>
    %cst_5 = arith.constant 1.000000e+00 : f32
    %14 = vector.broadcast %cst_5 : f32 to vector<8x128xf32>
    %15 = arith.subf %14, %13 : vector<8x128xf32>
    %cst_6 = arith.constant 0.000000e+00 : f32
    %16 = vector.broadcast %cst_6 : f32 to vector<8x128xf32>
    %17 = arith.maximumf %15, %16 : vector<8x128xf32>
    %18 = math.sqrt %17 : vector<8x128xf32>
    %19 = arith.mulf %10, %18 : vector<8x128xf32>
    %20 = arith.divf %19, %6 : vector<8x128xf32>
    %cst_7 = arith.constant 1.90417826 : f32
    %21 = vector.broadcast %cst_7 : f32 to vector<8x128xf32>
    %22 = arith.mulf %12, %21 : vector<8x128xf32>
    %23 = arith.subf %20, %22 : vector<8x128xf32>
    %cst_8 = arith.constant -0.0145235676 : f32
    %24 = vector.broadcast %cst_8 : f32 to vector<8x128xf32>
    %25 = arith.mulf %24, %23 : vector<8x128xf32>
    %26 = arith.addf %25, %12 : vector<8x128xf32>
    %27 = arith.mulf %26, %26 : vector<8x128xf32>
    %cst_9 = arith.constant 1.000000e+00 : f32
    %28 = vector.broadcast %cst_9 : f32 to vector<8x128xf32>
    %29 = arith.subf %28, %27 : vector<8x128xf32>
    %cst_10 = arith.constant 0.000000e+00 : f32
    %30 = vector.broadcast %cst_10 : f32 to vector<8x128xf32>
    %31 = arith.maximumf %29, %30 : vector<8x128xf32>
    %32 = math.sqrt %31 : vector<8x128xf32>
    %cst_11 = arith.constant 0.659282684 : f32
    %33 = vector.broadcast %cst_11 : f32 to vector<8x128xf32>
    %34 = arith.mulf %26, %33 : vector<8x128xf32>
    %35 = arith.mulf %34, %34 : vector<8x128xf32>
    %cst_12 = arith.constant 1.000000e+00 : f32
    %36 = vector.broadcast %cst_12 : f32 to vector<8x128xf32>
    %37 = arith.subf %36, %35 : vector<8x128xf32>
    %cst_13 = arith.constant 0.000000e+00 : f32
    %38 = vector.broadcast %cst_13 : f32 to vector<8x128xf32>
    %39 = arith.maximumf %37, %38 : vector<8x128xf32>
    %40 = math.sqrt %39 : vector<8x128xf32>
    %41 = arith.mulf %34, %32 : vector<8x128xf32>
    %42 = arith.mulf %40, %26 : vector<8x128xf32>
    %43 = arith.subf %41, %42 : vector<8x128xf32>
    %44 = arith.mulf %40, %32 : vector<8x128xf32>
    %45 = arith.mulf %34, %26 : vector<8x128xf32>
    %46 = arith.addf %44, %45 : vector<8x128xf32>
    %47 = arith.mulf %12, %46 : vector<8x128xf32>
    %48 = arith.mulf %18, %43 : vector<8x128xf32>
    %49 = arith.addf %47, %48 : vector<8x128xf32>
    %50 = arith.mulf %18, %46 : vector<8x128xf32>
    %51 = arith.mulf %12, %43 : vector<8x128xf32>
    %52 = arith.subf %50, %51 : vector<8x128xf32>
    %53 = arith.subf %34, %49 : vector<8x128xf32>
    %cst_14 = arith.constant -68.8536072 : f32
    %54 = vector.broadcast %cst_14 : f32 to vector<8x128xf32>
    %55 = arith.mulf %53, %54 : vector<8x128xf32>
    %cst_15 = arith.constant 4.75364685 : f32
    %56 = vector.broadcast %cst_15 : f32 to vector<8x128xf32>
    %57 = arith.mulf %49, %56 : vector<8x128xf32>
    %58 = arith.subf %55, %57 : vector<8x128xf32>
    %cst_16 = arith.constant 0.0206846278 : f32
    %59 = vector.broadcast %cst_16 : f32 to vector<8x128xf32>
    %60 = arith.mulf %59, %58 : vector<8x128xf32>
    %61 = arith.addf %60, %49 : vector<8x128xf32>
    %62 = arith.mulf %61, %61 : vector<8x128xf32>
    %cst_17 = arith.constant 1.000000e+00 : f32
    %63 = vector.broadcast %cst_17 : f32 to vector<8x128xf32>
    %64 = arith.subf %63, %62 : vector<8x128xf32>
    %cst_18 = arith.constant 0.000000e+00 : f32
    %65 = vector.broadcast %cst_18 : f32 to vector<8x128xf32>
    %66 = arith.maximumf %64, %65 : vector<8x128xf32>
    %67 = math.sqrt %66 : vector<8x128xf32>
    %cst_19 = arith.constant 1.516800e+00 : f32
    %68 = vector.broadcast %cst_19 : f32 to vector<8x128xf32>
    %69 = arith.mulf %61, %68 : vector<8x128xf32>
    %70 = arith.mulf %69, %69 : vector<8x128xf32>
    %cst_20 = arith.constant 1.000000e+00 : f32
    %71 = vector.broadcast %cst_20 : f32 to vector<8x128xf32>
    %72 = arith.subf %71, %70 : vector<8x128xf32>
    %cst_21 = arith.constant 0.000000e+00 : f32
    %73 = vector.broadcast %cst_21 : f32 to vector<8x128xf32>
    %74 = arith.maximumf %72, %73 : vector<8x128xf32>
    %75 = math.sqrt %74 : vector<8x128xf32>
    %76 = arith.mulf %69, %67 : vector<8x128xf32>
    %77 = arith.mulf %75, %61 : vector<8x128xf32>
    %78 = arith.subf %76, %77 : vector<8x128xf32>
    %79 = arith.mulf %75, %67 : vector<8x128xf32>
    %80 = arith.mulf %69, %61 : vector<8x128xf32>
    %81 = arith.addf %79, %80 : vector<8x128xf32>
    %82 = arith.mulf %49, %81 : vector<8x128xf32>
    %83 = arith.mulf %52, %78 : vector<8x128xf32>
    %84 = arith.addf %82, %83 : vector<8x128xf32>
    %85 = arith.mulf %52, %81 : vector<8x128xf32>
    %86 = arith.mulf %49, %78 : vector<8x128xf32>
    %87 = arith.subf %85, %86 : vector<8x128xf32>
    %88 = arith.subf %69, %84 : vector<8x128xf32>
    %cst_22 = arith.constant 48.3450813 : f32
    %89 = vector.broadcast %cst_22 : f32 to vector<8x128xf32>
    %90 = arith.mulf %88, %89 : vector<8x128xf32>
    %91 = arith.divf %84, %87 : vector<8x128xf32>
    %92 = arith.divf %90, %84 : vector<8x128xf32>
    %cst_23 = arith.constant 0.000000e+00 : f32
    %93 = vector.broadcast %cst_23 : f32 to vector<8x128xf32>
    %94 = arith.subf %93, %92 : vector<8x128xf32>
    %95 = arith.mulf %91, %94 : vector<8x128xf32>
    %c0_i32 = arith.constant 0 : i32
    %96 = vector.broadcast %c0_i32 : i32 to vector<8x128xi32>
    %97 = arith.cmpi eq, %0, %96 : vector<8x128xi32>
    %c1_i32_24 = arith.constant 1 : i32
    %98 = vector.broadcast %c1_i32_24 : i32 to vector<8x128xi32>
    %99 = arith.cmpi eq, %0, %98 : vector<8x128xi32>
    %cst_25 = arith.constant -1.000000e+00 : f32
    %cst_26 = arith.constant 0.000000e+00 : f32
    %100 = vector.broadcast %cst_25 : f32 to vector<8x128xf32>
    %101 = vector.broadcast %cst_26 : f32 to vector<8x128xf32>
    %102 = arith.select %99, %100, %101 : vector<8x128xi1>, vector<8x128xf32>
    %cst_27 = arith.constant 1.000000e+00 : f32
    %103 = vector.broadcast %cst_27 : f32 to vector<8x128xf32>
    %104 = arith.select %97, %103, %102 : vector<8x128xi1>, vector<8x128xf32>
    %105 = arith.mulf %104, %95 : vector<8x128xf32>
    %cst_28 = arith.constant dense<0.000000e+00> : vector<8xf32>
    %106 = vector.multi_reduction <add>, %105, %cst_28 [1] : vector<8x128xf32> to vector<8xf32>
    %107 = vector.shape_cast %106 : vector<8xf32> to vector<8x1xf32>
    %108 = arith.mulf %104, %91 : vector<8x128xf32>
    %cst_29 = arith.constant dense<0.000000e+00> : vector<8xf32>
    %109 = vector.multi_reduction <add>, %108, %cst_29 [1] : vector<8x128xf32> to vector<8xf32>
    %110 = vector.shape_cast %109 : vector<8xf32> to vector<8x1xf32>
    %111 = arith.divf %107, %110 : vector<8x1xf32>
    %112 = vector.shape_cast %111 : vector<8x1xf32> to vector<8x1xf32>
    %113 = vector.broadcast %112 : vector<8x1xf32> to vector<8x128xf32>
    %c0 = arith.constant 0 : index
    %c0_30 = arith.constant 0 : index
    %114 = vector.load %arg5[%c0, %c0_30] : memref<8x128xf32, #tpu.memory_space<vmem>>, vector<8x128xf32>
    tpu.vector_store %arg5[%c0, %c0_30], %113 {strides = array<i32>} : memref<8x128xf32, #tpu.memory_space<vmem>>, vector<8x128xf32>,
    %c0_31 = arith.constant 0 : index
    %c0_32 = arith.constant 0 : index
    %115 = vector.load %arg1[%c0_31, %c0_32] : memref<8x128xf32, #tpu.memory_space<vmem>>, vector<8x128xf32>
    %c0_33 = arith.constant 0 : index
    %c0_34 = arith.constant 0 : index
    %116 = vector.load %arg2[%c0_33, %c0_34] : memref<8x128xf32, #tpu.memory_space<vmem>>, vector<8x128xf32>
    %117 = arith.mulf %116, %113 : vector<8x128xf32>
    %118 = arith.addf %115, %117 : vector<8x128xf32>
    %c0_35 = arith.constant 0 : index
    %c0_36 = arith.constant 0 : index
    %119 = vector.load %arg3[%c0_35, %c0_36] : memref<8x128xf32, #tpu.memory_space<vmem>>, vector<8x128xf32>
    %c0_37 = arith.constant 0 : index
    %c0_38 = arith.constant 0 : index
    %120 = vector.load %arg4[%c0_37, %c0_38] : memref<8x128xf32, #tpu.memory_space<vmem>>, vector<8x128xf32>
    %c0_39 = arith.constant 0 : index
    %c0_40 = arith.constant 0 : index
    %c0_41 = arith.constant 0 : index
    %121 = vector.load %arg6[%c0_39, %c0_40, %c0_41] : memref<6x8x128xf32, #tpu.memory_space<vmem>>, vector<1x8x128xf32>
    %122 = vector.shape_cast %121 : vector<1x8x128xf32> to vector<8x128xf32>
    %123 = vector.shape_cast %118 : vector<8x128xf32> to vector<1x8x128xf32>
    tpu.vector_store %arg6[%c0_39, %c0_40, %c0_41], %123 {strides = array<i32>} : memref<6x8x128xf32, #tpu.memory_space<vmem>>, vector<1x8x128xf32>,
    %c0_42 = arith.constant 0 : index
    %c0_43 = arith.constant 0 : index
    %c0_44 = arith.constant 0 : index
    %124 = vector.load %arg7[%c0_42, %c0_43, %c0_44] : memref<6x8x128xf32, #tpu.memory_space<vmem>>, vector<1x8x128xf32>
    %125 = vector.shape_cast %124 : vector<1x8x128xf32> to vector<8x128xf32>
    %126 = vector.shape_cast %119 : vector<8x128xf32> to vector<1x8x128xf32>
    tpu.vector_store %arg7[%c0_42, %c0_43, %c0_44], %126 {strides = array<i32>} : memref<6x8x128xf32, #tpu.memory_space<vmem>>, vector<1x8x128xf32>,
    %c0_45 = arith.constant 0 : index
    %c0_46 = arith.constant 0 : index
    %c0_47 = arith.constant 0 : index
    %127 = vector.load %arg8[%c0_45, %c0_46, %c0_47] : memref<6x8x128xf32, #tpu.memory_space<vmem>>, vector<1x8x128xf32>
    %128 = vector.shape_cast %127 : vector<1x8x128xf32> to vector<8x128xf32>
    %129 = vector.shape_cast %120 : vector<8x128xf32> to vector<1x8x128xf32>
    tpu.vector_store %arg8[%c0_45, %c0_46, %c0_47], %129 {strides = array<i32>} : memref<6x8x128xf32, #tpu.memory_space<vmem>>, vector<1x8x128xf32>,
    %cst_48 = arith.constant 0.000000e+00 : f32
    %130 = vector.broadcast %cst_48 : f32 to vector<8x128xf32>
    %131 = arith.mulf %119, %130 : vector<8x128xf32>
    %132 = arith.addf %118, %131 : vector<8x128xf32>
    %cst_49 = arith.constant 0.0206846278 : f32
    %133 = vector.broadcast %cst_49 : f32 to vector<8x128xf32>
    %134 = arith.mulf %132, %133 : vector<8x128xf32>
    %135 = arith.addf %134, %119 : vector<8x128xf32>
    %136 = arith.mulf %135, %135 : vector<8x128xf32>
    %cst_50 = arith.constant 1.000000e+00 : f32
    %137 = vector.broadcast %cst_50 : f32 to vector<8x128xf32>
    %138 = arith.subf %137, %136 : vector<8x128xf32>
    %cst_51 = arith.constant 0.000000e+00 : f32
    %139 = vector.broadcast %cst_51 : f32 to vector<8x128xf32>
    %140 = arith.maximumf %138, %139 : vector<8x128xf32>
    %141 = math.sqrt %140 : vector<8x128xf32>
    %cst_52 = arith.constant 0.659282684 : f32
    %142 = vector.broadcast %cst_52 : f32 to vector<8x128xf32>
    %143 = arith.mulf %135, %142 : vector<8x128xf32>
    %144 = arith.mulf %143, %143 : vector<8x128xf32>
    %cst_53 = arith.constant 1.000000e+00 : f32
    %145 = vector.broadcast %cst_53 : f32 to vector<8x128xf32>
    %146 = arith.subf %145, %144 : vector<8x128xf32>
    %cst_54 = arith.constant 0.000000e+00 : f32
    %147 = vector.broadcast %cst_54 : f32 to vector<8x128xf32>
    %148 = arith.maximumf %146, %147 : vector<8x128xf32>
    %149 = math.sqrt %148 : vector<8x128xf32>
    %150 = arith.mulf %143, %141 : vector<8x128xf32>
    %151 = arith.mulf %149, %135 : vector<8x128xf32>
    %152 = arith.subf %150, %151 : vector<8x128xf32>
    %153 = arith.mulf %149, %141 : vector<8x128xf32>
    %154 = arith.mulf %143, %135 : vector<8x128xf32>
    %155 = arith.addf %153, %154 : vector<8x128xf32>
    %156 = arith.mulf %119, %155 : vector<8x128xf32>
    %157 = arith.mulf %120, %152 : vector<8x128xf32>
    %158 = arith.addf %156, %157 : vector<8x128xf32>
    %159 = arith.mulf %120, %155 : vector<8x128xf32>
    %160 = arith.mulf %119, %152 : vector<8x128xf32>
    %161 = arith.subf %159, %160 : vector<8x128xf32>
    %162 = arith.subf %143, %158 : vector<8x128xf32>
    %cst_55 = arith.constant 48.3450813 : f32
    %163 = vector.broadcast %cst_55 : f32 to vector<8x128xf32>
    %164 = arith.mulf %162, %163 : vector<8x128xf32>
    %c1 = arith.constant 1 : index
    %c0_56 = arith.constant 0 : index
    %c0_57 = arith.constant 0 : index
    %165 = vector.load %arg6[%c1, %c0_56, %c0_57] : memref<6x8x128xf32, #tpu.memory_space<vmem>>, vector<1x8x128xf32>
    %166 = vector.shape_cast %165 : vector<1x8x128xf32> to vector<8x128xf32>
    %167 = vector.shape_cast %164 : vector<8x128xf32> to vector<1x8x128xf32>
    tpu.vector_store %arg6[%c1, %c0_56, %c0_57], %167 {strides = array<i32>} : memref<6x8x128xf32, #tpu.memory_space<vmem>>, vector<1x8x128xf32>,
    %c1_58 = arith.constant 1 : index
    %c0_59 = arith.constant 0 : index
    %c0_60 = arith.constant 0 : index
    %168 = vector.load %arg7[%c1_58, %c0_59, %c0_60] : memref<6x8x128xf32, #tpu.memory_space<vmem>>, vector<1x8x128xf32>
    %169 = vector.shape_cast %168 : vector<1x8x128xf32> to vector<8x128xf32>
    %170 = vector.shape_cast %158 : vector<8x128xf32> to vector<1x8x128xf32>
    tpu.vector_store %arg7[%c1_58, %c0_59, %c0_60], %170 {strides = array<i32>} : memref<6x8x128xf32, #tpu.memory_space<vmem>>, vector<1x8x128xf32>,
    %c1_61 = arith.constant 1 : index
    %c0_62 = arith.constant 0 : index
    %c0_63 = arith.constant 0 : index
    %171 = vector.load %arg8[%c1_61, %c0_62, %c0_63] : memref<6x8x128xf32, #tpu.memory_space<vmem>>, vector<1x8x128xf32>
    %172 = vector.shape_cast %171 : vector<1x8x128xf32> to vector<8x128xf32>
    %173 = vector.shape_cast %161 : vector<8x128xf32> to vector<1x8x128xf32>
    tpu.vector_store %arg8[%c1_61, %c0_62, %c0_63], %173 {strides = array<i32>} : memref<6x8x128xf32, #tpu.memory_space<vmem>>, vector<1x8x128xf32>,
    %cst_64 = arith.constant 4.75364685 : f32
    %174 = vector.broadcast %cst_64 : f32 to vector<8x128xf32>
    %175 = arith.mulf %158, %174 : vector<8x128xf32>
    %176 = arith.addf %164, %175 : vector<8x128xf32>
    %cst_65 = arith.constant -0.0145235676 : f32
    %177 = vector.broadcast %cst_65 : f32 to vector<8x128xf32>
    %178 = arith.mulf %176, %177 : vector<8x128xf32>
    %179 = arith.addf %178, %158 : vector<8x128xf32>
    %180 = arith.mulf %179, %179 : vector<8x128xf32>
    %cst_66 = arith.constant 1.000000e+00 : f32
    %181 = vector.broadcast %cst_66 : f32 to vector<8x128xf32>
    %182 = arith.subf %181, %180 : vector<8x128xf32>
    %cst_67 = arith.constant 0.000000e+00 : f32
    %183 = vector.broadcast %cst_67 : f32 to vector<8x128xf32>
    %184 = arith.maximumf %182, %183 : vector<8x128xf32>
    %185 = math.sqrt %184 : vector<8x128xf32>
    %cst_68 = arith.constant 1.516800e+00 : f32
    %186 = vector.broadcast %cst_68 : f32 to vector<8x128xf32>
    %187 = arith.mulf %179, %186 : vector<8x128xf32>
    %188 = arith.mulf %187, %187 : vector<8x128xf32>
    %cst_69 = arith.constant 1.000000e+00 : f32
    %189 = vector.broadcast %cst_69 : f32 to vector<8x128xf32>
    %190 = arith.subf %189, %188 : vector<8x128xf32>
    %cst_70 = arith.constant 0.000000e+00 : f32
    %191 = vector.broadcast %cst_70 : f32 to vector<8x128xf32>
    %192 = arith.maximumf %190, %191 : vector<8x128xf32>
    %193 = math.sqrt %192 : vector<8x128xf32>
    %194 = arith.mulf %187, %185 : vector<8x128xf32>
    %195 = arith.mulf %193, %179 : vector<8x128xf32>
    %196 = arith.subf %194, %195 : vector<8x128xf32>
    %197 = arith.mulf %193, %185 : vector<8x128xf32>
    %198 = arith.mulf %187, %179 : vector<8x128xf32>
    %199 = arith.addf %197, %198 : vector<8x128xf32>
    %200 = arith.mulf %158, %199 : vector<8x128xf32>
    %201 = arith.mulf %161, %196 : vector<8x128xf32>
    %202 = arith.addf %200, %201 : vector<8x128xf32>
    %203 = arith.mulf %161, %199 : vector<8x128xf32>
    %204 = arith.mulf %158, %196 : vector<8x128xf32>
    %205 = arith.subf %203, %204 : vector<8x128xf32>
    %206 = arith.subf %187, %202 : vector<8x128xf32>
    %cst_71 = arith.constant -68.8536072 : f32
    %207 = vector.broadcast %cst_71 : f32 to vector<8x128xf32>
    %208 = arith.mulf %206, %207 : vector<8x128xf32>
    %c2 = arith.constant 2 : index
    %c0_72 = arith.constant 0 : index
    %c0_73 = arith.constant 0 : index
    %209 = vector.load %arg6[%c2, %c0_72, %c0_73] : memref<6x8x128xf32, #tpu.memory_space<vmem>>, vector<1x8x128xf32>
    %210 = vector.shape_cast %209 : vector<1x8x128xf32> to vector<8x128xf32>
    %211 = vector.shape_cast %208 : vector<8x128xf32> to vector<1x8x128xf32>
    tpu.vector_store %arg6[%c2, %c0_72, %c0_73], %211 {strides = array<i32>} : memref<6x8x128xf32, #tpu.memory_space<vmem>>, vector<1x8x128xf32>,
    %c2_74 = arith.constant 2 : index
    %c0_75 = arith.constant 0 : index
    %c0_76 = arith.constant 0 : index
    %212 = vector.load %arg7[%c2_74, %c0_75, %c0_76] : memref<6x8x128xf32, #tpu.memory_space<vmem>>, vector<1x8x128xf32>
    %213 = vector.shape_cast %212 : vector<1x8x128xf32> to vector<8x128xf32>
    %214 = vector.shape_cast %202 : vector<8x128xf32> to vector<1x8x128xf32>
    tpu.vector_store %arg7[%c2_74, %c0_75, %c0_76], %214 {strides = array<i32>} : memref<6x8x128xf32, #tpu.memory_space<vmem>>, vector<1x8x128xf32>,
    %c2_77 = arith.constant 2 : index
    %c0_78 = arith.constant 0 : index
    %c0_79 = arith.constant 0 : index
    %215 = vector.load %arg8[%c2_77, %c0_78, %c0_79] : memref<6x8x128xf32, #tpu.memory_space<vmem>>, vector<1x8x128xf32>
    %216 = vector.shape_cast %215 : vector<1x8x128xf32> to vector<8x128xf32>
    %217 = vector.shape_cast %205 : vector<8x128xf32> to vector<1x8x128xf32>
    tpu.vector_store %arg8[%c2_77, %c0_78, %c0_79], %217 {strides = array<i32>} : memref<6x8x128xf32, #tpu.memory_space<vmem>>, vector<1x8x128xf32>,
    %cst_80 = arith.constant 1.90417826 : f32
    %218 = vector.broadcast %cst_80 : f32 to vector<8x128xf32>
    %219 = arith.mulf %202, %218 : vector<8x128xf32>
    %220 = arith.addf %208, %219 : vector<8x128xf32>
    %cst_81 = arith.constant 0.597835839 : f32
    %221 = vector.broadcast %cst_81 : f32 to vector<8x128xf32>
    %222 = arith.mulf %202, %221 : vector<8x128xf32>
    %223 = arith.mulf %222, %222 : vector<8x128xf32>
    %cst_82 = arith.constant 1.000000e+00 : f32
    %224 = vector.broadcast %cst_82 : f32 to vector<8x128xf32>
    %225 = arith.subf %224, %223 : vector<8x128xf32>
    %cst_83 = arith.constant 0.000000e+00 : f32
    %226 = vector.broadcast %cst_83 : f32 to vector<8x128xf32>
    %227 = arith.maximumf %225, %226 : vector<8x128xf32>
    %228 = math.sqrt %227 : vector<8x128xf32>
    %229 = arith.mulf %220, %228 : vector<8x128xf32>
    %230 = arith.divf %229, %205 : vector<8x128xf32>
    %c3 = arith.constant 3 : index
    %c0_84 = arith.constant 0 : index
    %c0_85 = arith.constant 0 : index
    %231 = vector.load %arg6[%c3, %c0_84, %c0_85] : memref<6x8x128xf32, #tpu.memory_space<vmem>>, vector<1x8x128xf32>
    %232 = vector.shape_cast %231 : vector<1x8x128xf32> to vector<8x128xf32>
    %233 = vector.shape_cast %230 : vector<8x128xf32> to vector<1x8x128xf32>
    tpu.vector_store %arg6[%c3, %c0_84, %c0_85], %233 {strides = array<i32>} : memref<6x8x128xf32, #tpu.memory_space<vmem>>, vector<1x8x128xf32>,
    %c3_86 = arith.constant 3 : index
    %c0_87 = arith.constant 0 : index
    %c0_88 = arith.constant 0 : index
    %234 = vector.load %arg7[%c3_86, %c0_87, %c0_88] : memref<6x8x128xf32, #tpu.memory_space<vmem>>, vector<1x8x128xf32>
    %235 = vector.shape_cast %234 : vector<1x8x128xf32> to vector<8x128xf32>
    %236 = vector.shape_cast %222 : vector<8x128xf32> to vector<1x8x128xf32>
    tpu.vector_store %arg7[%c3_86, %c0_87, %c0_88], %236 {strides = array<i32>} : memref<6x8x128xf32, #tpu.memory_space<vmem>>, vector<1x8x128xf32>,
    %c3_89 = arith.constant 3 : index
    %c0_90 = arith.constant 0 : index
    %c0_91 = arith.constant 0 : index
    %237 = vector.load %arg8[%c3_89, %c0_90, %c0_91] : memref<6x8x128xf32, #tpu.memory_space<vmem>>, vector<1x8x128xf32>
    %238 = vector.shape_cast %237 : vector<1x8x128xf32> to vector<8x128xf32>
    %239 = vector.shape_cast %228 : vector<8x128xf32> to vector<1x8x128xf32>
    tpu.vector_store %arg8[%c3_89, %c0_90, %c0_91], %239 {strides = array<i32>} : memref<6x8x128xf32, #tpu.memory_space<vmem>>, vector<1x8x128xf32>,
    %cst_92 = arith.constant 3.02442789 : f32
    %240 = vector.broadcast %cst_92 : f32 to vector<8x128xf32>
    %241 = arith.mulf %222, %240 : vector<8x128xf32>
    %242 = arith.addf %230, %241 : vector<8x128xf32>
    %cst_93 = arith.constant -0.00962072518 : f32
    %243 = vector.broadcast %cst_93 : f32 to vector<8x128xf32>
    %244 = arith.mulf %242, %243 : vector<8x128xf32>
    %245 = arith.addf %244, %222 : vector<8x128xf32>
    %246 = arith.mulf %245, %245 : vector<8x128xf32>
    %cst_94 = arith.constant 1.000000e+00 : f32
    %247 = vector.broadcast %cst_94 : f32 to vector<8x128xf32>
    %248 = arith.subf %247, %246 : vector<8x128xf32>
    %cst_95 = arith.constant 0.000000e+00 : f32
    %249 = vector.broadcast %cst_95 : f32 to vector<8x128xf32>
    %250 = arith.maximumf %248, %249 : vector<8x128xf32>
    %251 = math.sqrt %250 : vector<8x128xf32>
    %cst_96 = arith.constant 1.672700e+00 : f32
    %252 = vector.broadcast %cst_96 : f32 to vector<8x128xf32>
    %253 = arith.mulf %245, %252 : vector<8x128xf32>
    %254 = arith.mulf %253, %253 : vector<8x128xf32>
    %cst_97 = arith.constant 1.000000e+00 : f32
    %255 = vector.broadcast %cst_97 : f32 to vector<8x128xf32>
    %256 = arith.subf %255, %254 : vector<8x128xf32>
    %cst_98 = arith.constant 0.000000e+00 : f32
    %257 = vector.broadcast %cst_98 : f32 to vector<8x128xf32>
    %258 = arith.maximumf %256, %257 : vector<8x128xf32>
    %259 = math.sqrt %258 : vector<8x128xf32>
    %260 = arith.mulf %253, %251 : vector<8x128xf32>
    %261 = arith.mulf %259, %245 : vector<8x128xf32>
    %262 = arith.subf %260, %261 : vector<8x128xf32>
    %263 = arith.mulf %259, %251 : vector<8x128xf32>
    %264 = arith.mulf %253, %245 : vector<8x128xf32>
    %265 = arith.addf %263, %264 : vector<8x128xf32>
    %266 = arith.mulf %222, %265 : vector<8x128xf32>
    %267 = arith.mulf %228, %262 : vector<8x128xf32>
    %268 = arith.addf %266, %267 : vector<8x128xf32>
    %269 = arith.mulf %228, %265 : vector<8x128xf32>
    %270 = arith.mulf %222, %262 : vector<8x128xf32>
    %271 = arith.subf %269, %270 : vector<8x128xf32>
    %272 = arith.subf %253, %268 : vector<8x128xf32>
    %cst_99 = arith.constant -103.942261 : f32
    %273 = vector.broadcast %cst_99 : f32 to vector<8x128xf32>
    %274 = arith.mulf %272, %273 : vector<8x128xf32>
    %c4 = arith.constant 4 : index
    %c0_100 = arith.constant 0 : index
    %c0_101 = arith.constant 0 : index
    %275 = vector.load %arg6[%c4, %c0_100, %c0_101] : memref<6x8x128xf32, #tpu.memory_space<vmem>>, vector<1x8x128xf32>
    %276 = vector.shape_cast %275 : vector<1x8x128xf32> to vector<8x128xf32>
    %277 = vector.shape_cast %274 : vector<8x128xf32> to vector<1x8x128xf32>
    tpu.vector_store %arg6[%c4, %c0_100, %c0_101], %277 {strides = array<i32>} : memref<6x8x128xf32, #tpu.memory_space<vmem>>, vector<1x8x128xf32>,
    %c4_102 = arith.constant 4 : index
    %c0_103 = arith.constant 0 : index
    %c0_104 = arith.constant 0 : index
    %278 = vector.load %arg7[%c4_102, %c0_103, %c0_104] : memref<6x8x128xf32, #tpu.memory_space<vmem>>, vector<1x8x128xf32>
    %279 = vector.shape_cast %278 : vector<1x8x128xf32> to vector<8x128xf32>
    %280 = vector.shape_cast %268 : vector<8x128xf32> to vector<1x8x128xf32>
    tpu.vector_store %arg7[%c4_102, %c0_103, %c0_104], %280 {strides = array<i32>} : memref<6x8x128xf32, #tpu.memory_space<vmem>>, vector<1x8x128xf32>,
    %c4_105 = arith.constant 4 : index
    %c0_106 = arith.constant 0 : index
    %c0_107 = arith.constant 0 : index
    %281 = vector.load %arg8[%c4_105, %c0_106, %c0_107] : memref<6x8x128xf32, #tpu.memory_space<vmem>>, vector<1x8x128xf32>
    %282 = vector.shape_cast %281 : vector<1x8x128xf32> to vector<8x128xf32>
    %283 = vector.shape_cast %271 : vector<8x128xf32> to vector<1x8x128xf32>
    tpu.vector_store %arg8[%c4_105, %c0_106, %c0_107], %283 {strides = array<i32>} : memref<6x8x128xf32, #tpu.memory_space<vmem>>, vector<1x8x128xf32>,
    %cst_108 = arith.constant 39.4473534 : f32
    %284 = vector.broadcast %cst_108 : f32 to vector<8x128xf32>
    %285 = arith.mulf %268, %284 : vector<8x128xf32>
    %286 = arith.addf %274, %285 : vector<8x128xf32>
    %cst_109 = arith.constant 0.00484590651 : f32
    %287 = vector.broadcast %cst_109 : f32 to vector<8x128xf32>
    %288 = arith.mulf %286, %287 : vector<8x128xf32>
    %289 = arith.addf %288, %268 : vector<8x128xf32>
    %290 = arith.mulf %289, %289 : vector<8x128xf32>
    %cst_110 = arith.constant 1.000000e+00 : f32
    %291 = vector.broadcast %cst_110 : f32 to vector<8x128xf32>
    %292 = arith.subf %291, %290 : vector<8x128xf32>
    %cst_111 = arith.constant 0.000000e+00 : f32
    %293 = vector.broadcast %cst_111 : f32 to vector<8x128xf32>
    %294 = arith.maximumf %292, %293 : vector<8x128xf32>
    %295 = math.sqrt %294 : vector<8x128xf32>
    %cst_112 = arith.constant 1.000000e+00 : f32
    %296 = vector.broadcast %cst_112 : f32 to vector<8x128xf32>
    %297 = arith.mulf %289, %296 : vector<8x128xf32>
    %298 = arith.mulf %297, %297 : vector<8x128xf32>
    %cst_113 = arith.constant 1.000000e+00 : f32
    %299 = vector.broadcast %cst_113 : f32 to vector<8x128xf32>
    %300 = arith.subf %299, %298 : vector<8x128xf32>
    %cst_114 = arith.constant 0.000000e+00 : f32
    %301 = vector.broadcast %cst_114 : f32 to vector<8x128xf32>
    %302 = arith.maximumf %300, %301 : vector<8x128xf32>
    %303 = math.sqrt %302 : vector<8x128xf32>
    %304 = arith.mulf %297, %295 : vector<8x128xf32>
    %305 = arith.mulf %303, %289 : vector<8x128xf32>
    %306 = arith.subf %304, %305 : vector<8x128xf32>
    %307 = arith.mulf %303, %295 : vector<8x128xf32>
    %308 = arith.mulf %297, %289 : vector<8x128xf32>
    %309 = arith.addf %307, %308 : vector<8x128xf32>
    %310 = arith.mulf %268, %309 : vector<8x128xf32>
    %311 = arith.mulf %271, %306 : vector<8x128xf32>
    %312 = arith.addf %310, %311 : vector<8x128xf32>
    %313 = arith.mulf %271, %309 : vector<8x128xf32>
    %314 = arith.mulf %268, %306 : vector<8x128xf32>
    %315 = arith.subf %313, %314 : vector<8x128xf32>
    %316 = arith.subf %297, %312 : vector<8x128xf32>
    %cst_115 = arith.constant 206.359726 : f32
    %317 = vector.broadcast %cst_115 : f32 to vector<8x128xf32>
    %318 = arith.mulf %316, %317 : vector<8x128xf32>
    %c5 = arith.constant 5 : index
    %c0_116 = arith.constant 0 : index
    %c0_117 = arith.constant 0 : index
    %319 = vector.load %arg6[%c5, %c0_116, %c0_117] : memref<6x8x128xf32, #tpu.memory_space<vmem>>, vector<1x8x128xf32>
    %320 = vector.shape_cast %319 : vector<1x8x128xf32> to vector<8x128xf32>
    %321 = vector.shape_cast %318 : vector<8x128xf32> to vector<1x8x128xf32>
    tpu.vector_store %arg6[%c5, %c0_116, %c0_117], %321 {strides = array<i32>} : memref<6x8x128xf32, #tpu.memory_space<vmem>>, vector<1x8x128xf32>,
    %c5_118 = arith.constant 5 : index
    %c0_119 = arith.constant 0 : index
    %c0_120 = arith.constant 0 : index
    %322 = vector.load %arg7[%c5_118, %c0_119, %c0_120] : memref<6x8x128xf32, #tpu.memory_space<vmem>>, vector<1x8x128xf32>
    %323 = vector.shape_cast %322 : vector<1x8x128xf32> to vector<8x128xf32>
    %324 = vector.shape_cast %312 : vector<8x128xf32> to vector<1x8x128xf32>
    tpu.vector_store %arg7[%c5_118, %c0_119, %c0_120], %324 {strides = array<i32>} : memref<6x8x128xf32, #tpu.memory_space<vmem>>, vector<1x8x128xf32>,
    %c5_121 = arith.constant 5 : index
    %c0_122 = arith.constant 0 : index
    %c0_123 = arith.constant 0 : index
    %325 = vector.load %arg8[%c5_121, %c0_122, %c0_123] : memref<6x8x128xf32, #tpu.memory_space<vmem>>, vector<1x8x128xf32>
    %326 = vector.shape_cast %325 : vector<1x8x128xf32> to vector<8x128xf32>
    %327 = vector.shape_cast %315 : vector<8x128xf32> to vector<1x8x128xf32>
    tpu.vector_store %arg8[%c5_121, %c0_122, %c0_123], %327 {strides = array<i32>} : memref<6x8x128xf32, #tpu.memory_space<vmem>>, vector<1x8x128xf32>,
    return
  }
  func.func @transform_0(%arg0: i32) -> (i32, i32) {
    %c0_i32 = arith.constant 0 : i32
    %c0_i32_0 = arith.constant 0 : i32
    %c0_i32_1 = arith.constant 0 : i32
    return %c0_i32, %c0_i32_0 : i32, i32
  }
  func.func @transform_1(%arg0: i32) -> (i32, i32) {
    %c0_i32 = arith.constant 0 : i32
    %c0_i32_0 = arith.constant 0 : i32
    %c0_i32_1 = arith.constant 0 : i32
    return %c0_i32, %c0_i32_0 : i32, i32
  }
  func.func @transform_2(%arg0: i32) -> (i32, i32) {
    %c0_i32 = arith.constant 0 : i32
    %c0_i32_0 = arith.constant 0 : i32
    %c0_i32_1 = arith.constant 0 : i32
    return %c0_i32, %c0_i32_0 : i32, i32
  }
  func.func @transform_3(%arg0: i32) -> (i32, i32) {
    %c0_i32 = arith.constant 0 : i32
    %c0_i32_0 = arith.constant 0 : i32
    %c0_i32_1 = arith.constant 0 : i32
    return %c0_i32, %c0_i32_0 : i32, i32
  }
  func.func @transform_4(%arg0: i32) -> (i32, i32) {
    %c0_i32 = arith.constant 0 : i32
    %c0_i32_0 = arith.constant 0 : i32
    %c0_i32_1 = arith.constant 0 : i32
    return %c0_i32, %c0_i32_0 : i32, i32
  }
  func.func @transform_5(%arg0: i32) -> (i32, i32, i32) {
    %c0_i32 = arith.constant 0 : i32
    %c0_i32_0 = arith.constant 0 : i32
    %c0_i32_1 = arith.constant 0 : i32
    %c0_i32_2 = arith.constant 0 : i32
    return %c0_i32, %c0_i32_0, %c0_i32_1 : i32, i32, i32
  }
  func.func @transform_6(%arg0: i32) -> (i32, i32, i32) {
    %c0_i32 = arith.constant 0 : i32
    %c0_i32_0 = arith.constant 0 : i32
    %c0_i32_1 = arith.constant 0 : i32
    %c0_i32_2 = arith.constant 0 : i32
    return %c0_i32, %c0_i32_0, %c0_i32_1 : i32, i32, i32
  }
  func.func @transform_7(%arg0: i32) -> (i32, i32, i32) {
    %c0_i32 = arith.constant 0 : i32
    %c0_i32_0 = arith.constant 0 : i32
    %c0_i32_1 = arith.constant 0 : i32
    %c0_i32_2 = arith.constant 0 : i32
    return %c0_i32, %c0_i32_0, %c0_i32_1 : i32, i32, i32
  }
}

</mosaic_0001>

<bundles_post_ra>
// kernel: tpu_custom_call.1
= control target key start
LH: loop header
LB: loop body
LE: loop exit
PB: predicated region body
PF: predicated region fallthrough
CT: control target
= control target key end

     0   :  { %13 = vsyncpa [#allocation3], 0  ;;  %s970_s0 = inlined_call_operand.hbm [shape: f32[8,128], index: 0, kind: input, shape index: {}]   ;;  %s971_s1 = inlined_call_operand.hbm [shape: f32[8,128], index: 1, kind: input, shape index: {}]   ;;  %s972_s2 = inlined_call_operand.hbm [shape: f32[8,128], index: 2, kind: input, shape index: {}]   ;;  %s973_s3 = inlined_call_operand.hbm [shape: f32[8,128], index: 3, kind: input, shape index: {}]   ;;  %s974_s4 = inlined_call_operand.hbm [shape: f32[8,128], index: 4, kind: output, shape index: {0}]   ;;  %s975_s5 = inlined_call_operand.hbm [shape: f32[6,8,128], index: 5, kind: output, shape index: {1}]   ;;  %s976_s6 = inlined_call_operand.hbm [shape: f32[6,8,128], index: 6, kind: output, shape index: {2}]   ;;  %s977_s7 = inlined_call_operand.hbm [shape: f32[6,8,128], index: 7, kind: output, shape index: {3}]  }
   0x1   :  { %14 = vsyncpa [#allocation6], 0 }
   0x2   :  { %15 = vsyncpa [#allocation9], 0 }
   0x3   :  { %16 = vsyncpa [#allocation4], 0 }
   0x4   :  { %17 = vsyncpa [#allocation12], 0  ;;  %s35_s26 = sshll.u32 %s971_s1, 4  ;;  %s36_s26 = int_to_ptr.hbm [resolvable:$true] %s35_s26 }
   0x5   :  { %18 = vsyncpa [#allocation15], 0  ;;  %s841_s27 = smov [#allocation5]   ;;  %s24_s8 = sshll.u32 %s970_s0, 4  ;;  %s25_s8 = int_to_ptr.hbm [resolvable:$true] %s24_s8 }
   0x6   :  { %s37_s28 = sshll.u32 %s841_s27, 4  ;;  %s842_s9 = smov [#allocation2]   ;;  %s38_s28 = int_to_ptr.vmem [resolvable:$true] %s37_s28 }
   0x7   :  { %40 = dma.hbm_to_vmem [thread:$0]  %s36_s26, 128, %s38_s28, [#allocation6]  }
   0x8   :  { %s26_s10 = sshll.u32 %s842_s9, 4  ;;  %s46_s13 = sshll.u32 %s972_s2, 4  ;;  %s27_s10 = int_to_ptr.vmem [resolvable:$true] %s26_s10  ;;  %s47_s13 = int_to_ptr.hbm [resolvable:$true] %s46_s13 }
   0x9   :  { %29 = dma.hbm_to_vmem [thread:$0]  %s25_s8, 128, %s27_s10, [#allocation3]  }
   0xa   :  { %s57_s15 = sshll.u32 %s973_s3, 4  ;;  %s843_s16 = smov [#allocation7]   ;;  %s58_s15 = int_to_ptr.hbm [resolvable:$true] %s57_s15 }
   0xb   :  { %s48_s17 = sshll.u32 %s843_s16, 4  ;;  %s844_s0 = smov [#allocation8]   ;;  %s49_s17 = int_to_ptr.vmem [resolvable:$true] %s48_s17 }
   0xc   :  { %51 = dma.hbm_to_vmem [thread:$0]  %s47_s13, 128, %s49_s17, [#allocation6]  }
   0xd   :  { %s59_s18 = sshll.u32 %s844_s0, 4  ;;  %s60_s18 = int_to_ptr.vmem [resolvable:$true] %s59_s18 }
   0xe   :  { %62 = dma.hbm_to_vmem [thread:$0]  %s58_s15, 128, %s60_s18, [#allocation9]  }
   0xf   :  { %829 = dma.done.wait [#allocation3], 128  }
  0x10   :  { %830 = vsyncadd [#allocation3], 4294967168 }
  0x11   :  { %831 = dma.done.wait [#allocation6], 256  }
  0x12   :  { %832 = vsyncadd [#allocation6], 4294967040  ;;  %v79_v0 = vlaneseq }
  0x13   :  { %833 = dma.done.wait [#allocation9], 128  }
  0x14   :  { %834 = vsyncadd [#allocation9], 4294967168  ;;  %v906_v1 = vand.u32 127, %v79_v0  ;;  %v845_v2 = vmov 0.0017453284   ;;  %s848_s2 = smov [#allocation10]  }
  0x15   :  { %v846_v6 = vmov 0.99999845   ;;  %s521_s3 = sshll.u32 %s848_s2, 4  ;;  %s523_s21 = sshll.u32 %s974_s4, 4  ;;  %s522_s3 = int_to_ptr.vmem [resolvable:$true] %s521_s3  ;;  %s524_s21 = int_to_ptr.hbm [resolvable:$true] %s523_s21 }
  0x16   :  { %vm81_vm0 = vcmp.eq.s32.totalorder %v906_v1, 1  ;;  %601 = vrcp.f32 %v846_v6  ;;  %s849_s4 = smov [#allocation11]   ;;  %s850_s23 = smov [#allocation14]  }
  0x17   :  { %v82_v3 = vsel %vm81_vm0, -0.0017453284, %v845_v2  ;;  %s958_s22 = sshll.u32 %s849_s4, 4  ;;  %s557_s24 = sshll.u32 %s850_s23, 4  ;;  %s558_s24 = int_to_ptr.vmem [resolvable:$true] %s557_s24  ;;  %s532_s22 = int_to_ptr.vmem [resolvable:$true] %s958_s22 }
  0x18   :  { %v911_v4 = vmul.f32 1.6727, %v82_v3  ;;  %v83_v17 = vmul.f32 3.024428, %v82_v3  ;;  %s559_s27 = sshll.u32 %s977_s7, 4  ;;  %s533_s30 = sshll.u32 %s975_s5, 4  ;;  %s560_s27 = int_to_ptr.hbm [resolvable:$true] %s559_s27  ;;  %s534_s30 = int_to_ptr.hbm [resolvable:$true] %s533_s30 }
  0x19   :  { %s851_s8 = smov [#allocation13]   ;;  %s546_s12 = sshll.u32 %s976_s6, 4  ;;  %s547_s12 = int_to_ptr.hbm [resolvable:$true] %s546_s12 }
  0x1a   :  { %v86_v5 = vmul.f32 %v911_v4, %v911_v4  ;;  %v84_v22 = vsub.f32 0.0, %v83_v17  ;;  %v110_v28 = vmul.f32 1.9041783, %v911_v4  ;;  %s544_s9 = sshll.u32 %s851_s8, 4  ;;  %s852_s7 = smov 128   ;;  %s545_s9 = int_to_ptr.vmem [resolvable:$true] %s544_s9 }
  0x1b   :  { %s853_s13 = smov 8  }
  0x1c   :  { %v87_v7 = vsub.f32 1.0, %v86_v5  ;;  %v602_v9 = vpop.eup %601 }
  0x1d   :  { %v103_v10 = vmul.f32 0.99999845, %v602_v9  ;;  %vm107_vm3 = vweird.f32 %v602_v9 }
  0x1e   :  { %v88_v8 = vmax.f32 %v87_v7, 0.0 }
  0x1f   :  { %v104_v13 = vsub.f32 1.0, %v103_v10 }
  0x20   :  { %603 = vrsqrt.f32 %v88_v8  ;;  %vm96_vm1 = vcmp.eq.f32.partialorder %v88_v8, inf  ;;  %v99_v20 = vand.u32 2147483648, %v88_v8  ;;  %vm98_vm2 = vcmp.eq.f32.partialorder %v88_v8, 0.0 }
  0x21   :  { %v105_v16 = vmul.f32 %v602_v9, %v104_v13 }
  0x23   :  { %v106_v21 = vadd.f32 %v602_v9, %v105_v16 }
  0x25   :  { %v108_v26 = vsel %vm107_vm3, %v602_v9, %v106_v21 }
  0x26   :  { %v604_v11 = vpop.eup %603 }
  0x27   :  { %v90_v12 = vmul.f32 %v604_v11, %v88_v8 }
  0x29   :  { %v91_v14 = vmul.f32 %v604_v11, %v90_v12 }
  0x2b   :  { %v92_v15 = vmul.f32 0.5, %v91_v14 }
  0x2d   :  { %v93_v18 = vsub.f32 1.5, %v92_v15 }
  0x2f   :  { %v94_v19 = vmul.f32 %v604_v11, %v93_v18 }
  0x31   :  { %v95_v23 = vmul.f32 %v94_v19, %v88_v8 }
  0x33   :  { %v97_v24 = vsel %vm96_vm1, %v88_v8, %v95_v23 }
  0x34   :  { %v915_v25 = vsel %vm98_vm2, %v99_v20, %v97_v24  ;;  %vm240_vm2 = vcmp.eq.s32.totalorder %v906_v1, 0  ;;  %v934_v1 = vld [vmem:[#allocation7] sm:$0xff] }
  0x35   :  { %v101_v27 = vmul.f32 %v915_v25, %v84_v22  ;;  %272 = vst [vmem:[#allocation13] sm:$0xff] %v934_v1 }
  0x37   :  { %v109_v29 = vmul.f32 %v108_v26, %v101_v27 }
  0x39   :  { %v111_v30 = vsub.f32 %v109_v29, %v110_v28 }
  0x3b   :  { %v112_v31 = vmul.f32 -0.014523568, %v111_v30 }
  0x3d   :  { %v113_v32 = vadd.f32 %v112_v31, %v911_v4 }
  0x3f   :  { %v114_v33 = vmul.f32 %v113_v32, %v113_v32  ;;  %v129_v34 = vmul.f32 0.6592827, %v113_v32 }
  0x41   :  { %v115_v35 = vsub.f32 1.0, %v114_v33  ;;  %v130_v36 = vmul.f32 %v129_v34, %v129_v34  ;;  %v149_v60 = vmul.f32 %v129_v34, %v113_v32 }
  0x43   :  { %v116_v37 = vmax.f32 %v115_v35, 0.0  ;;  %v131_v38 = vsub.f32 1.0, %v130_v36 }
  0x45   :  { %605 = vrsqrt.f32 %v116_v37  ;;  %v132_v39 = vmax.f32 %v131_v38, 0.0  ;;  %vm124_vm4 = vcmp.eq.f32.partialorder %v116_v37, inf  ;;  %v127_v50 = vand.u32 2147483648, %v116_v37 }
  0x46   :  { %vm126_vm5 = vcmp.eq.f32.partialorder %v116_v37, 0.0 }
  0x47   :  { %607 = vrsqrt.f32 %v132_v39  ;;  %vm140_vm6 = vcmp.eq.f32.partialorder %v132_v39, inf  ;;  %v143_v55 = vand.u32 2147483648, %v132_v39  ;;  %vm142_vm7 = vcmp.eq.f32.partialorder %v132_v39, 0.0 }
  0x4b   :  { %v606_v40 = vpop.eup %605 }
  0x4c   :  { %v118_v41 = vmul.f32 %v606_v40, %v116_v37 }
  0x4d   :  { %v608_v42 = vpop.eup %607 }
  0x4e   :  { %v119_v43 = vmul.f32 %v606_v40, %v118_v41  ;;  %v134_v44 = vmul.f32 %v608_v42, %v132_v39 }
  0x50   :  { %v120_v45 = vmul.f32 0.5, %v119_v43  ;;  %v135_v46 = vmul.f32 %v608_v42, %v134_v44 }
  0x52   :  { %v121_v47 = vsub.f32 1.5, %v120_v45  ;;  %v136_v48 = vmul.f32 0.5, %v135_v46 }
  0x54   :  { %v122_v49 = vmul.f32 %v606_v40, %v121_v47  ;;  %v137_v51 = vsub.f32 1.5, %v136_v48 }
  0x56   :  { %v123_v52 = vmul.f32 %v122_v49, %v116_v37  ;;  %v138_v53 = vmul.f32 %v608_v42, %v137_v51 }
  0x58   :  { %v125_v54 = vsel %vm124_vm4, %v116_v37, %v123_v52  ;;  %v139_v57 = vmul.f32 %v138_v53, %v132_v39 }
  0x59   :  { %v128_v56 = vsel %vm126_vm5, %v127_v50, %v125_v54 }
  0x5a   :  { %v141_v58 = vsel %vm140_vm6, %v132_v39, %v139_v57  ;;  %v145_v59 = vmul.f32 %v129_v34, %v128_v56 }
  0x5b   :  { %v144_v61 = vsel %vm142_vm7, %v143_v55, %v141_v58 }
  0x5c   :  { %v146_v62 = vmul.f32 %v144_v61, %v113_v32  ;;  %v148_v63 = vmul.f32 %v144_v61, %v128_v56 }
  0x5e   :  { %v147_v0 = vsub.f32 %v145_v59, %v146_v62  ;;  %v150_v2 = vadd.f32 %v149_v60, %v148_v63 }
  0x60   :  { %v151_v3 = vmul.f32 %v150_v2, %v911_v4  ;;  %v152_v5 = vmul.f32 %v147_v0, %v915_v25  ;;  %v154_v35 = vmul.f32 %v150_v2, %v915_v25  ;;  %v155_v38 = vmul.f32 %v147_v0, %v911_v4 }
  0x62   :  { %v153_v6 = vadd.f32 %v152_v5, %v151_v3  ;;  %v156_v45 = vsub.f32 %v154_v35, %v155_v38 }
  0x64   :  { %v157_v7 = vsub.f32 %v129_v34, %v153_v6  ;;  %v159_v8 = vmul.f32 4.753647, %v153_v6 }
  0x66   :  { %v158_v9 = vmul.f32 -68.85361, %v157_v7  ;;  %v847_v7 = vmov 0.0  }
  0x68   :  { %v160_v10 = vsub.f32 %v158_v9, %v159_v8  ;;  %v241_v8 = vsel %vm81_vm0, -1.0, %v847_v7 }
  0x6a   :  { %v161_v11 = vmul.f32 0.020684628, %v160_v10 }
  0x6c   :  { %v162_v12 = vadd.f32 %v161_v11, %v153_v6 }
  0x6e   :  { %v163_v13 = vmul.f32 %v162_v12, %v162_v12  ;;  %v922_v14 = vmul.f32 1.5168, %v162_v12 }
  0x70   :  { %v164_v15 = vsub.f32 1.0, %v163_v13  ;;  %v179_v16 = vmul.f32 %v922_v14, %v922_v14  ;;  %v198_v43 = vmul.f32 %v922_v14, %v162_v12 }
  0x72   :  { %v165_v17 = vmax.f32 %v164_v15, 0.0  ;;  %v180_v18 = vsub.f32 1.0, %v179_v16 }
  0x74   :  { %609 = vrsqrt.f32 %v165_v17  ;;  %v181_v19 = vmax.f32 %v180_v18, 0.0  ;;  %vm173_vm8 = vcmp.eq.f32.partialorder %v165_v17, inf  ;;  %v176_v31 = vand.u32 2147483648, %v165_v17 }
  0x75   :  { %vm175_vm9 = vcmp.eq.f32.partialorder %v165_v17, 0.0 }
  0x76   :  { %611 = vrsqrt.f32 %v181_v19  ;;  %vm189_vm10 = vcmp.eq.f32.partialorder %v181_v19, inf  ;;  %v192_v37 = vand.u32 2147483648, %v181_v19  ;;  %vm191_vm11 = vcmp.eq.f32.partialorder %v181_v19, 0.0 }
  0x7a   :  { %v610_v20 = vpop.eup %609 }
  0x7b   :  { %v167_v21 = vmul.f32 %v610_v20, %v165_v17 }
  0x7c   :  { %v612_v22 = vpop.eup %611 }
  0x7d   :  { %v168_v23 = vmul.f32 %v610_v20, %v167_v21  ;;  %v183_v24 = vmul.f32 %v612_v22, %v181_v19 }
  0x7f   :  { %v169_v26 = vmul.f32 0.5, %v168_v23  ;;  %v184_v27 = vmul.f32 %v612_v22, %v183_v24  ;;  %v936_v23 = vld [vmem:[#allocation8] sm:$0xff] }
  0x80   :  { %273 = vst [vmem:[#allocation14] sm:$0xff] %v936_v23 }
  0x81   :  { %v170_v28 = vsub.f32 1.5, %v169_v26  ;;  %v185_v29 = vmul.f32 0.5, %v184_v27 }
  0x83   :  { %v171_v30 = vmul.f32 %v610_v20, %v170_v28  ;;  %v186_v32 = vsub.f32 1.5, %v185_v29 }
  0x85   :  { %v172_v33 = vmul.f32 %v171_v30, %v165_v17  ;;  %v187_v34 = vmul.f32 %v612_v22, %v186_v32 }
  0x87   :  { %v174_v36 = vsel %vm173_vm8, %v165_v17, %v172_v33  ;;  %v188_v40 = vmul.f32 %v187_v34, %v181_v19 }
  0x88   :  { %v177_v39 = vsel %vm175_vm9, %v176_v31, %v174_v36 }
  0x89   :  { %v190_v41 = vsel %vm189_vm10, %v181_v19, %v188_v40  ;;  %v194_v42 = vmul.f32 %v922_v14, %v177_v39 }
  0x8a   :  { %v193_v44 = vsel %vm191_vm11, %v192_v37, %v190_v41  ;;  %v266_v37 = vld [vmem:[#allocation5] sm:$0xff]  ;;  %v274_v41 = vmul.f32 0.0, %v934_v1 }
  0x8b   :  { %v195_v46 = vmul.f32 %v193_v44, %v162_v12  ;;  %v197_v47 = vmul.f32 %v193_v44, %v177_v39  ;;  %v265_v39 = vld [vmem:[#allocation2] sm:$0xff] }
  0x8d   :  { %v196_v48 = vsub.f32 %v194_v42, %v195_v46  ;;  %v199_v49 = vadd.f32 %v198_v43, %v197_v47 }
  0x8f   :  { %v200_v25 = vmul.f32 %v199_v49, %v153_v6  ;;  %v201_v50 = vmul.f32 %v196_v48, %v156_v45  ;;  %v203_v51 = vmul.f32 %v199_v49, %v156_v45  ;;  %v204_v52 = vmul.f32 %v196_v48, %v153_v6 }
  0x91   :  { %v202_v53 = vadd.f32 %v201_v50, %v200_v25  ;;  %v205_v4 = vsub.f32 %v203_v51, %v204_v52 }
  0x93   :  { %613 = vrcp.f32 %v205_v4  ;;  %vm213_vm12 = vweird.f32 %v205_v4  ;;  %v217_v57 = vand.u32 2147483647, %v205_v4  ;;  %v219_v58 = vand.u32 2147483648, %v205_v4 }
  0x94   :  { %615 = vrcp.f32 %v202_v53  ;;  %v206_v61 = vsub.f32 %v922_v14, %v202_v53  ;;  %v234_v62 = vand.u32 2147483648, %v202_v53  ;;  %vm228_vm14 = vweird.f32 %v202_v53 }
  0x95   :  { %v232_v0 = vand.u32 2147483647, %v202_v53  ;;  %v220_v3 = vor.u32 1.1754944e-38, %v219_v58  ;;  %vm218_vm3 = vcmp.eq.f32.partialorder %v217_v57, 8.507059e+37  ;;  %v242_v14 = vsel %vm240_vm2, 1.0, %v241_v8 }
  0x96   :  { %v235_v9 = vor.u32 1.1754944e-38, %v234_v62  ;;  %v207_v10 = vmul.f32 48.34508, %v206_v61 }
  0x97   :  { %vm233_vm5 = vcmp.eq.f32.partialorder %v232_v0, 8.507059e+37 }
  0x99   :  { %v614_v54 = vpop.eup %613 }
  0x9a   :  { %v616_v55 = vpop.eup %615  ;;  %v209_v56 = vmul.f32 %v614_v54, %v205_v4  ;;  %vm214_vm13 = vweird.f32 %v614_v54 }
  0x9b   :  { %v224_v59 = vmul.f32 %v616_v55, %v202_v53  ;;  %vm229_vm15 = vweird.f32 %v616_v55  ;;  %vm215_vm1 = vmor %vm213_vm12, %vm214_vm13 }
  0x9c   :  { %v210_v60 = vsub.f32 1.0, %v209_v56  ;;  %vm230_vm4 = vmor %vm228_vm14, %vm229_vm15 }
  0x9d   :  { %v225_v63 = vsub.f32 1.0, %v224_v59 }
  0x9e   :  { %v211_v2 = vmul.f32 %v614_v54, %v210_v60 }
  0x9f   :  { %v226_v5 = vmul.f32 %v616_v55, %v225_v63 }
  0xa0   :  { %v212_v6 = vadd.f32 %v614_v54, %v211_v2 }
  0xa1   :  { %v227_v11 = vadd.f32 %v616_v55, %v226_v5 }
  0xa2   :  { %v216_v12 = vsel %vm215_vm1, %v614_v54, %v212_v6 }
  0xa3   :  { %v221_v13 = vsel %vm218_vm3, %v220_v3, %v216_v12  ;;  %v231_v15 = vsel %vm230_vm4, %v616_v55, %v227_v11 }
  0xa4   :  { %v222_v16 = vmul.f32 %v221_v13, %v202_v53  ;;  %v236_v17 = vsel %vm233_vm5, %v235_v9, %v231_v15 }
  0xa5   :  { %v237_v18 = vmul.f32 %v236_v17, %v207_v10 }
  0xa6   :  { %v246_v19 = vmul.f32 %v242_v14, %v222_v16 }
  0xa7   :  { %v238_v20 = vsub.f32 0.0, %v237_v18 }
  0xa8   :  { %247 = vadd.xlane.f32.xlu0 %v246_v19 }
  0xa9   :  { %v239_v21 = vmul.f32 %v238_v20, %v222_v16 }
  0xab   :  { %v243_v22 = vmul.f32 %v242_v14, %v239_v21 }
  0xb0   :  { %244 = vadd.xlane.f32.xlu0 %v243_v22 }
 0x11b   :  { %v248_v24 = vpop.xlane.xlu0 %247 }
 0x11c   :  { %617 = vrcp.f32 %v248_v24  ;;  %v260_v29 = vand.u32 2147483648, %v248_v24  ;;  %v258_v31 = vand.u32 2147483647, %v248_v24  ;;  %vm254_vm6 = vweird.f32 %v248_v24 }
 0x11e   :  { %v261_v33 = vor.u32 1.1754944e-38, %v260_v29  ;;  %vm259_vm8 = vcmp.eq.f32.partialorder %v258_v31, 8.507059e+37 }
 0x122   :  { %v618_v26 = vpop.eup %617 }
 0x123   :  { %v250_v27 = vmul.f32 %v618_v26, %v248_v24  ;;  %vm255_vm0 = vweird.f32 %v618_v26  ;;  %v245_v34 = vpop.xlane.xlu0 %244 }
 0x124   :  { %vm256_vm7 = vmor %vm254_vm6, %vm255_vm0 }
 0x125   :  { %v251_v28 = vsub.f32 1.0, %v250_v27 }
 0x127   :  { %v252_v30 = vmul.f32 %v618_v26, %v251_v28 }
 0x129   :  { %v253_v32 = vadd.f32 %v618_v26, %v252_v30 }
 0x12b   :  { %v257_v35 = vsel %vm256_vm7, %v618_v26, %v253_v32 }
 0x12c   :  { %v262_v36 = vsel %vm259_vm8, %v261_v33, %v257_v35 }
 0x12d   :  { %v263_v38 = vmul.f32 %v262_v36, %v245_v34 }
 0x12f   :  { %264 = vst [vmem:[#allocation10] sm:$0xff] %v263_v38  ;;  %v267_v40 = vmul.f32 %v266_v37, %v263_v38 }
 0x130   :  { %526 = dma.vmem_to_hbm [thread:$0]  %s522_s3, 128, %s524_s21, [#allocation4]  }
 0x131   :  { %v268_v42 = vadd.f32 %v267_v40, %v265_v39 }
 0x133   :  { %271 = vst [vmem:[#allocation11] sm:$0xff] %v268_v42  ;;  %v275_v43 = vadd.f32 %v274_v41, %v268_v42 }
 0x135   :  { %v276_v44 = vmul.f32 0.020684628, %v275_v43 }
 0x137   :  { %v277_v45 = vadd.f32 %v276_v44, %v934_v1 }
 0x139   :  { %v278_v46 = vmul.f32 %v277_v45, %v277_v45  ;;  %v293_v47 = vmul.f32 0.6592827, %v277_v45 }
 0x13b   :  { %v279_v48 = vsub.f32 1.0, %v278_v46  ;;  %v294_v49 = vmul.f32 %v293_v47, %v293_v47  ;;  %v313_v12 = vmul.f32 %v293_v47, %v277_v45 }
 0x13d   :  { %v280_v25 = vmax.f32 %v279_v48, 0.0  ;;  %v295_v50 = vsub.f32 1.0, %v294_v49 }
 0x13f   :  { %619 = vrsqrt.f32 %v280_v25  ;;  %v296_v51 = vmax.f32 %v295_v50, 0.0  ;;  %vm288_vm9 = vcmp.eq.f32.partialorder %v280_v25, inf  ;;  %v291_v2 = vand.u32 2147483648, %v280_v25 }
 0x140   :  { %vm290_vm10 = vcmp.eq.f32.partialorder %v280_v25, 0.0 }
 0x141   :  { %621 = vrsqrt.f32 %v296_v51  ;;  %vm304_vm11 = vcmp.eq.f32.partialorder %v296_v51, inf  ;;  %v307_v6 = vand.u32 2147483648, %v296_v51  ;;  %vm306_vm12 = vcmp.eq.f32.partialorder %v296_v51, 0.0 }
 0x145   :  { %v620_v52 = vpop.eup %619 }
 0x146   :  { %v282_v53 = vmul.f32 %v620_v52, %v280_v25 }
 0x147   :  { %v622_v4 = vpop.eup %621 }
 0x148   :  { %v283_v54 = vmul.f32 %v620_v52, %v282_v53  ;;  %v298_v55 = vmul.f32 %v622_v4, %v296_v51 }
 0x14a   :  { %v284_v56 = vmul.f32 0.5, %v283_v54  ;;  %v299_v57 = vmul.f32 %v622_v4, %v298_v55 }
 0x14c   :  { %v285_v58 = vsub.f32 1.5, %v284_v56  ;;  %v300_v59 = vmul.f32 0.5, %v299_v57 }
 0x14e   :  { %v286_v60 = vmul.f32 %v620_v52, %v285_v58  ;;  %v301_v61 = vsub.f32 1.5, %v300_v59 }
 0x150   :  { %v287_v62 = vmul.f32 %v286_v60, %v280_v25  ;;  %v302_v63 = vmul.f32 %v622_v4, %v301_v61 }
 0x152   :  { %v289_v0 = vsel %vm288_vm9, %v280_v25, %v287_v62  ;;  %v303_v3 = vmul.f32 %v302_v63, %v296_v51 }
 0x153   :  { %v292_v5 = vsel %vm290_vm10, %v291_v2, %v289_v0 }
 0x154   :  { %v305_v7 = vsel %vm304_vm11, %v296_v51, %v303_v3  ;;  %v309_v9 = vmul.f32 %v293_v47, %v292_v5 }
 0x155   :  { %v308_v8 = vsel %vm306_vm12, %v307_v6, %v305_v7 }
 0x156   :  { %v310_v10 = vmul.f32 %v308_v8, %v277_v45  ;;  %v312_v11 = vmul.f32 %v308_v8, %v292_v5 }
 0x158   :  { %v311_v13 = vsub.f32 %v309_v9, %v310_v10  ;;  %v314_v14 = vadd.f32 %v313_v12, %v312_v11 }
 0x15a   :  { %v315_v15 = vmul.f32 %v314_v14, %v934_v1  ;;  %v316_v16 = vmul.f32 %v311_v13, %v936_v23  ;;  %v318_v17 = vmul.f32 %v314_v14, %v936_v23  ;;  %v319_v18 = vmul.f32 %v311_v13, %v934_v1 }
 0x15c   :  { %v317_v19 = vadd.f32 %v316_v16, %v315_v15  ;;  %v320_v20 = vsub.f32 %v318_v17, %v319_v18 }
 0x15e   :  { %v321_v21 = vsub.f32 %v293_v47, %v317_v19  ;;  %328 = vst [vmem:[#allocation14 + $0x8] sm:$0xff] %v320_v20  ;;  %v329_v24 = vmul.f32 4.753647, %v317_v19 }
 0x15f   :  { %326 = vst [vmem:[#allocation13 + $0x8] sm:$0xff] %v317_v19 }
 0x160   :  { %v322_v22 = vmul.f32 48.34508, %v321_v21 }
 0x162   :  { %324 = vst [vmem:[#allocation11 + $0x8] sm:$0xff] %v322_v22  ;;  %v330_v26 = vadd.f32 %v329_v24, %v322_v22 }
 0x164   :  { %v331_v27 = vmul.f32 -0.014523568, %v330_v26 }
 0x166   :  { %v332_v28 = vadd.f32 %v331_v27, %v317_v19 }
 0x168   :  { %v333_v29 = vmul.f32 %v332_v28, %v332_v28  ;;  %v348_v30 = vmul.f32 1.5168, %v332_v28 }
 0x16a   :  { %v334_v31 = vsub.f32 1.0, %v333_v29  ;;  %v349_v32 = vmul.f32 %v348_v30, %v348_v30  ;;  %v368_v55 = vmul.f32 %v348_v30, %v332_v28 }
 0x16c   :  { %v335_v33 = vmax.f32 %v334_v31, 0.0  ;;  %v350_v34 = vsub.f32 1.0, %v349_v32 }
 0x16e   :  { %623 = vrsqrt.f32 %v335_v33  ;;  %v351_v23 = vmax.f32 %v350_v34, 0.0  ;;  %vm343_vm13 = vcmp.eq.f32.partialorder %v335_v33, inf  ;;  %v346_v48 = vand.u32 2147483648, %v335_v33 }
 0x16f   :  { %vm345_vm14 = vcmp.eq.f32.partialorder %v335_v33, 0.0 }
 0x170   :  { %625 = vrsqrt.f32 %v351_v23  ;;  %vm359_vm15 = vcmp.eq.f32.partialorder %v351_v23, inf  ;;  %v362_v50 = vand.u32 2147483648, %v351_v23  ;;  %vm361_vm1 = vcmp.eq.f32.partialorder %v351_v23, 0.0 }
 0x174   :  { %v624_v1 = vpop.eup %623 }
 0x175   :  { %v337_v35 = vmul.f32 %v624_v1, %v335_v33 }
 0x176   :  { %v626_v36 = vpop.eup %625 }
 0x177   :  { %v338_v37 = vmul.f32 %v624_v1, %v337_v35  ;;  %v353_v38 = vmul.f32 %v626_v36, %v351_v23 }
 0x179   :  { %v339_v39 = vmul.f32 0.5, %v338_v37  ;;  %v354_v40 = vmul.f32 %v626_v36, %v353_v38 }
 0x17b   :  { %v340_v41 = vsub.f32 1.5, %v339_v39  ;;  %v355_v42 = vmul.f32 0.5, %v354_v40 }
 0x17d   :  { %v341_v43 = vmul.f32 %v624_v1, %v340_v41  ;;  %v356_v44 = vsub.f32 1.5, %v355_v42 }
 0x17f   :  { %v342_v45 = vmul.f32 %v341_v43, %v335_v33  ;;  %v357_v46 = vmul.f32 %v626_v36, %v356_v44 }
 0x181   :  { %v344_v47 = vsel %vm343_vm13, %v335_v33, %v342_v45  ;;  %v358_v49 = vmul.f32 %v357_v46, %v351_v23 }
 0x182   :  { %v347_v25 = vsel %vm345_vm14, %v346_v48, %v344_v47 }
 0x183   :  { %v360_v51 = vsel %vm359_vm15, %v351_v23, %v358_v49  ;;  %v364_v53 = vmul.f32 %v348_v30, %v347_v25 }
 0x184   :  { %v363_v52 = vsel %vm361_vm1, %v362_v50, %v360_v51 }
 0x185   :  { %v365_v4 = vmul.f32 %v363_v52, %v332_v28  ;;  %v367_v54 = vmul.f32 %v363_v52, %v347_v25 }
 0x187   :  { %v366_v56 = vsub.f32 %v364_v53, %v365_v4  ;;  %v369_v57 = vadd.f32 %v368_v55, %v367_v54 }
 0x189   :  { %v370_v58 = vmul.f32 %v369_v57, %v317_v19  ;;  %v371_v59 = vmul.f32 %v366_v56, %v320_v20  ;;  %v373_v60 = vmul.f32 %v369_v57, %v320_v20  ;;  %v374_v61 = vmul.f32 %v366_v56, %v317_v19 }
 0x18b   :  { %v372_v62 = vadd.f32 %v371_v59, %v370_v58  ;;  %v375_v63 = vsub.f32 %v373_v60, %v374_v61 }
 0x18d   :  { %v946_v0 = vmul.f32 0.59783584, %v372_v62  ;;  %381 = vst [vmem:[#allocation13 + $0x10] sm:$0xff] %v372_v62  ;;  %v376_v2 = vsub.f32 %v348_v30, %v372_v62  ;;  %627 = vrcp.f32 %v375_v63  ;;  %v414_v19 = vand.u32 2147483648, %v375_v63 }
 0x18e   :  { %383 = vst [vmem:[#allocation14 + $0x10] sm:$0xff] %v375_v63  ;;  %v384_v20 = vmul.f32 1.9041783, %v372_v62  ;;  %vm408_vm3 = vweird.f32 %v375_v63  ;;  %v412_v22 = vand.u32 2147483647, %v375_v63 }
 0x18f   :  { %v387_v3 = vmul.f32 %v946_v0, %v946_v0  ;;  %421 = vst [vmem:[#allocation13 + $0x18] sm:$0xff] %v946_v0  ;;  %v377_v5 = vmul.f32 -68.85361, %v376_v2  ;;  %v415_v30 = vor.u32 1.1754944e-38, %v414_v19  ;;  %v424_v34 = vmul.f32 3.024428, %v946_v0 }
 0x190   :  { %vm413_vm6 = vcmp.eq.f32.partialorder %v412_v22, 8.507059e+37 }
 0x191   :  { %v388_v6 = vsub.f32 1.0, %v387_v3  ;;  %379 = vst [vmem:[#allocation11 + $0x10] sm:$0xff] %v377_v5  ;;  %v385_v26 = vadd.f32 %v384_v20, %v377_v5 }
 0x193   :  { %v389_v7 = vmax.f32 %v388_v6, 0.0  ;;  %v628_v8 = vpop.eup %627 }
 0x194   :  { %v404_v9 = vmul.f32 %v628_v8, %v375_v63  ;;  %vm409_vm2 = vweird.f32 %v628_v8 }
 0x195   :  { %629 = vrsqrt.f32 %v389_v7  ;;  %vm397_vm4 = vcmp.eq.f32.partialorder %v389_v7, inf  ;;  %v400_v24 = vand.u32 2147483648, %v389_v7  ;;  %vm410_vm5 = vmor %vm408_vm3, %vm409_vm2  ;;  %vm399_vm0 = vcmp.eq.f32.partialorder %v389_v7, 0.0 }
 0x196   :  { %v405_v12 = vsub.f32 1.0, %v404_v9 }
 0x198   :  { %v406_v15 = vmul.f32 %v628_v8, %v405_v12 }
 0x19a   :  { %v407_v18 = vadd.f32 %v628_v8, %v406_v15 }
 0x19b   :  { %v630_v10 = vpop.eup %629 }
 0x19c   :  { %v391_v11 = vmul.f32 %v630_v10, %v389_v7  ;;  %v411_v28 = vsel %vm410_vm5, %v628_v8, %v407_v18 }
 0x19d   :  { %v416_v32 = vsel %vm413_vm6, %v415_v30, %v411_v28 }
 0x19e   :  { %v392_v13 = vmul.f32 %v630_v10, %v391_v11 }
 0x1a0   :  { %v393_v14 = vmul.f32 0.5, %v392_v13 }
 0x1a2   :  { %v394_v16 = vsub.f32 1.5, %v393_v14 }
 0x1a4   :  { %v395_v17 = vmul.f32 %v630_v10, %v394_v16 }
 0x1a6   :  { %v396_v21 = vmul.f32 %v395_v17, %v389_v7 }
 0x1a8   :  { %v398_v27 = vsel %vm397_vm4, %v389_v7, %v396_v21 }
 0x1a9   :  { %v401_v29 = vsel %vm399_vm0, %v400_v24, %v398_v27 }
 0x1aa   :  { %v402_v31 = vmul.f32 %v401_v29, %v385_v26  ;;  %423 = vst [vmem:[#allocation14 + $0x18] sm:$0xff] %v401_v29 }
 0x1ac   :  { %v417_v33 = vmul.f32 %v416_v32, %v402_v31 }
 0x1ae   :  { %419 = vst [vmem:[#allocation11 + $0x18] sm:$0xff] %v417_v33  ;;  %v425_v23 = vadd.f32 %v424_v34, %v417_v33 }
 0x1b0   :  { %v426_v1 = vmul.f32 -0.009620725, %v425_v23 }
 0x1b2   :  { %v427_v35 = vadd.f32 %v426_v1, %v946_v0 }
 0x1b4   :  { %v428_v36 = vmul.f32 %v427_v35, %v427_v35  ;;  %v443_v37 = vmul.f32 1.6727, %v427_v35 }
 0x1b6   :  { %v429_v38 = vsub.f32 1.0, %v428_v36  ;;  %v444_v39 = vmul.f32 %v443_v37, %v443_v37  ;;  %v463_v2 = vmul.f32 %v443_v37, %v427_v35 }
 0x1b8   :  { %v430_v40 = vmax.f32 %v429_v38, 0.0  ;;  %v445_v41 = vsub.f32 1.0, %v444_v39 }
 0x1ba   :  { %631 = vrsqrt.f32 %v430_v40  ;;  %v446_v42 = vmax.f32 %v445_v41, 0.0  ;;  %vm438_vm7 = vcmp.eq.f32.partialorder %v430_v40, inf  ;;  %v441_v55 = vand.u32 2147483648, %v430_v40 }
 0x1bb   :  { %vm440_vm8 = vcmp.eq.f32.partialorder %v430_v40, 0.0 }
 0x1bc   :  { %633 = vrsqrt.f32 %v446_v42  ;;  %vm454_vm9 = vcmp.eq.f32.partialorder %v446_v42, inf  ;;  %v457_v58 = vand.u32 2147483648, %v446_v42  ;;  %vm456_vm10 = vcmp.eq.f32.partialorder %v446_v42, 0.0 }
 0x1c0   :  { %v632_v43 = vpop.eup %631 }
 0x1c1   :  { %v432_v44 = vmul.f32 %v632_v43, %v430_v40 }
 0x1c2   :  { %v634_v45 = vpop.eup %633 }
 0x1c3   :  { %v433_v46 = vmul.f32 %v632_v43, %v432_v44  ;;  %v448_v47 = vmul.f32 %v634_v45, %v446_v42 }
 0x1c5   :  { %v434_v48 = vmul.f32 0.5, %v433_v46  ;;  %v449_v49 = vmul.f32 %v634_v45, %v448_v47 }
 0x1c7   :  { %v435_v25 = vsub.f32 1.5, %v434_v48  ;;  %v450_v50 = vmul.f32 0.5, %v449_v49 }
 0x1c9   :  { %v436_v51 = vmul.f32 %v632_v43, %v435_v25  ;;  %v451_v52 = vsub.f32 1.5, %v450_v50 }
 0x1cb   :  { %v437_v53 = vmul.f32 %v436_v51, %v430_v40  ;;  %v452_v4 = vmul.f32 %v634_v45, %v451_v52 }
 0x1cd   :  { %v439_v54 = vsel %vm438_vm7, %v430_v40, %v437_v53  ;;  %v453_v56 = vmul.f32 %v452_v4, %v446_v42 }
 0x1ce   :  { %v442_v57 = vsel %vm440_vm8, %v441_v55, %v439_v54 }
 0x1cf   :  { %v455_v59 = vsel %vm454_vm9, %v446_v42, %v453_v56  ;;  %v459_v61 = vmul.f32 %v443_v37, %v442_v57 }
 0x1d0   :  { %v458_v60 = vsel %vm456_vm10, %v457_v58, %v455_v59 }
 0x1d1   :  { %v460_v62 = vmul.f32 %v458_v60, %v427_v35  ;;  %v462_v63 = vmul.f32 %v458_v60, %v442_v57 }
 0x1d3   :  { %v461_v3 = vsub.f32 %v459_v61, %v460_v62  ;;  %v464_v5 = vadd.f32 %v463_v2, %v462_v63 }
 0x1d5   :  { %v465_v6 = vmul.f32 %v464_v5, %v946_v0  ;;  %v466_v7 = vmul.f32 %v461_v3, %v401_v29  ;;  %v468_v8 = vmul.f32 %v464_v5, %v401_v29  ;;  %v469_v9 = vmul.f32 %v461_v3, %v946_v0 }
 0x1d7   :  { %v467_v10 = vadd.f32 %v466_v7, %v465_v6  ;;  %v470_v11 = vsub.f32 %v468_v8, %v469_v9 }
 0x1d9   :  { %v471_v12 = vsub.f32 %v443_v37, %v467_v10  ;;  %476 = vst [vmem:[#allocation13 + $0x20] sm:$0xff] %v467_v10  ;;  %v479_v14 = vmul.f32 39.447353, %v467_v10 }
 0x1da   :  { %478 = vst [vmem:[#allocation14 + $0x20] sm:$0xff] %v470_v11 }
 0x1db   :  { %v472_v13 = vmul.f32 -103.94226, %v471_v12 }
 0x1dd   :  { %474 = vst [vmem:[#allocation11 + $0x20] sm:$0xff] %v472_v13  ;;  %v480_v15 = vadd.f32 %v479_v14, %v472_v13 }
 0x1df   :  { %v481_v16 = vmul.f32 0.0048459065, %v480_v15 }
 0x1e1   :  { %v482_v17 = vadd.f32 %v481_v16, %v467_v10 }
 0x1e3   :  { %v483_v18 = vmul.f32 %v482_v17, %v482_v17 }
 0x1e5   :  { %v484_v19 = vsub.f32 1.0, %v483_v18 }
 0x1e7   :  { %v485_v20 = vmax.f32 %v484_v19, 0.0 }
 0x1e9   :  { %635 = vrsqrt.f32 %v485_v20  ;;  %vm493_vm11 = vcmp.eq.f32.partialorder %v485_v20, inf  ;;  %v496_v29 = vand.u32 2147483648, %v485_v20  ;;  %vm495_vm12 = vcmp.eq.f32.partialorder %v485_v20, 0.0 }
 0x1ef   :  { %v636_v21 = vpop.eup %635 }
 0x1f0   :  { %v487_v22 = vmul.f32 %v636_v21, %v485_v20 }
 0x1f2   :  { %v488_v24 = vmul.f32 %v636_v21, %v487_v22 }
 0x1f4   :  { %v489_v26 = vmul.f32 0.5, %v488_v24 }
 0x1f6   :  { %v490_v0 = vsub.f32 1.5, %v489_v26 }
 0x1f8   :  { %v491_v27 = vmul.f32 %v636_v21, %v490_v0 }
 0x1fa   :  { %v492_v28 = vmul.f32 %v491_v27, %v485_v20 }
 0x1fc   :  { %v494_v30 = vsel %vm493_vm11, %v485_v20, %v492_v28 }
 0x1fd   :  { %v497_v31 = vsel %vm495_vm12, %v496_v29, %v494_v30 }
 0x1fe   :  { %v498_v32 = vmul.f32 %v497_v31, %v482_v17  ;;  %v500_v33 = vmul.f32 %v497_v31, %v497_v31 }
 0x200   :  { %v499_v34 = vsub.f32 %v498_v32, %v498_v32  ;;  %v501_v23 = vadd.f32 %v500_v33, %v483_v18 }
 0x202   :  { %v502_v1 = vmul.f32 %v501_v23, %v467_v10  ;;  %v503_v35 = vmul.f32 %v499_v34, %v470_v11  ;;  %v505_v36 = vmul.f32 %v501_v23, %v470_v11  ;;  %v506_v37 = vmul.f32 %v499_v34, %v467_v10 }
 0x204   :  { %v504_v38 = vadd.f32 %v503_v35, %v502_v1  ;;  %v507_v39 = vsub.f32 %v505_v36, %v506_v37 }
 0x206   :  { %v508_v40 = vsub.f32 %v482_v17, %v504_v38  ;;  %513 = vst [vmem:[#allocation13 + $0x28] sm:$0xff] %v504_v38 }
 0x207   :  { %515 = vst [vmem:[#allocation14 + $0x28] sm:$0xff] %v507_v39 }
 0x208   :  { %v509_v41 = vmul.f32 206.35973, %v508_v40  ;;  %565 = dma.vmem_to_hbm [thread:$0]  %s558_s24, 768, %s560_s27, [#allocation15], %s852_s7, %s852_s7, %s853_s13  }
 0x20a   :  { %511 = vst [vmem:[#allocation11 + $0x28] sm:$0xff] %v509_v41 }
 0x20b   :  { %539 = dma.vmem_to_hbm [thread:$0]  %s532_s22, 768, %s534_s30, [#allocation12], %s852_s7, %s852_s7, %s853_s13  }
 0x20c   :  { %552 = dma.vmem_to_hbm [thread:$0]  %s545_s9, 768, %s547_s12, [#allocation12], %s852_s7, %s852_s7, %s853_s13  }
 0x20d   :  { %835 = dma.done.wait [#allocation4], 128  }
 0x20e   :  { %836 = vsyncadd [#allocation4], 4294967168 }
 0x20f   :  { %837 = dma.done.wait [#allocation12], 1536  }
 0x210   :  { %838 = vsyncadd [#allocation12], 4294965760 }
 0x211   :  { %839 = dma.done.wait [#allocation15], 768  }
 0x212   :  { %840 = vsyncadd [#allocation15], 4294966528 }
 0x213   :  { %582 = vsyncpa [#allocation3], 1 }
 0x214   :  { %583 = vsyncpa [#allocation6], 1 }
 0x215   :  { %584 = vsyncpa [#allocation9], 1 }
 0x216   :  { %585 = vsyncpa [#allocation4], 1 }
 0x217   :  { %586 = vsyncpa [#allocation12], 1 }
 0x218   :  { %587 = vsyncpa [#allocation15], 1 }

</bundles_post_ra>
